<compile_context>
chip_gen: v7x
topology: tpu7x:2x2x1
jax: 0.10.0
libtpu: 0.0.40
codegen_flags: <defaults>
</compile_context>

<pallas_src>
import functools

import numpy as np
import jax
import jax.numpy as jnp
from jax.experimental import pallas as pl
from jax.experimental.pallas import tpu as pltpu

C_PAD = 128  # lane-dense class dimension


def _graphsage_kernel(cnt_ref, kidx_ref, adj_ref, x_ref, scale_ref,
                      w_enc_ref, w_cls_ref, out_ref, acc_ref,
                      *, tk, feats_resident):
    i = pl.program_id(0)
    k = pl.program_id(1)
    n_valid = cnt_ref[i]          # number of nonzero adjacency tiles in row tile i

    @pl.when(k == 0)
    def _():
        acc_ref[...] = jnp.zeros_like(acc_ref)

    # Skip compute on padded schedule slots; their adjacency DMA is already
    # elided because the index_map repeats the previous block index.
    @pl.when(k < n_valid)
    def _():
        adj_tile = adj_ref[...].astype(jnp.bfloat16)      # 0/1 mask, exact in bf16
        if feats_resident:
            kk = kidx_ref[i, k]
            off = pl.multiple_of(kk * tk, tk)
            x_tile = x_ref[pl.ds(off, tk), :]
        else:
            x_tile = x_ref[...]
        acc_ref[...] += jnp.dot(adj_tile, x_tile,
                                preferred_element_type=jnp.float32)

    # Epilogue on the last valid k tile of this row tile: deferred mean
    # normalization, encoder linear + ReLU, classifier matmul.
    @pl.when(k == n_valid - 1)
    def _():
        agg = (acc_ref[...] * scale_ref[...]).astype(jnp.bfloat16)
        emb = jnp.maximum(
            jnp.dot(agg, w_enc_ref[...], preferred_element_type=jnp.float32), 0.0
        )
        out_ref[...] = jnp.dot(
            emb.astype(jnp.bfloat16), w_cls_ref[...],
            preferred_element_type=jnp.float32,
        )


def _build_tile_schedule(adj_mask_np, tm, tk):
    """Per row-tile list of nonzero column tiles (block-sparse schedule).

    Returns (cnt[NI], kidx[NI, KMAX], KMAX, nnz_tiles). Padded entries repeat
    the last valid tile index so the pipelined DMA is elided for them.
    """
    N = adj_mask_np.shape[0]
    NI, NK = N // tm, N // tk
    occ = adj_mask_np.reshape(NI, tm, NK, tk).any(axis=(1, 3))    # (NI, NK)
    cnt = occ.sum(axis=1).astype(np.int32)
    assert cnt.min() >= 1, "every row tile needs >=1 nonzero tile (add self loops)"
    kmax = int(cnt.max())
    kidx = np.zeros((NI, kmax), dtype=np.int32)
    for i in range(NI):
        ks = np.flatnonzero(occ[i])
        kidx[i, :ks.size] = ks
        kidx[i, ks.size:] = ks[-1]
    return cnt, kidx, kmax, int(occ.sum())


def supervised_graphsage_forward(adj_mask, feats, w_enc, w_cls, *, tm=512, tk=512):
    """scores = relu(mean_agg(adj, feats) @ w_enc.T) @ w_cls.T  -> (N, C).

    adj_mask: (N, N) 0/1 adjacency (self loops included). The block-sparse
    schedule is built eagerly from its concrete values, so call un-jitted.
    """
    N = adj_mask.shape[0]
    F = feats.shape[1]
    D = w_enc.shape[0]
    C = w_cls.shape[0]

    tm = min(tm, N)
    tk = min(tk, N)
    # Keep >= 2 row tiles so the "parallel" axis can shard across both v7x TCs.
    if N // tm < 2 and N >= 256:
        tm = N // 2
    assert N % tm == 0 and N % tk == 0, "pad N to a multiple of the tile sizes"
    # TODO(synk): ragged N (pad + masked last tile) not implemented.
    assert tm % 32 == 0 and tk % 128 == 0, "tiles must respect int8/(8,128) layout"
    assert C <= C_PAD

    # --- host-side block-sparse schedule over adjacency tiles ----------------
    adj_np = np.asarray(adj_mask) != 0
    cnt_np, kidx_np, kmax, nnz_tiles = _build_tile_schedule(adj_np, tm, tk)
    cnt = jnp.asarray(cnt_np)
    kidx = jnp.asarray(kidx_np)

    # --- operand layout / dtypes ---------------------------------------------
    # int8 0/1 mask halves adjacency HBM traffic; the mean normalization is a
    # deferred per-row f32 scale applied to the f32 accumulator.
    adj_i8 = (adj_mask != 0).astype(jnp.int8)
    deg = jnp.sum(adj_i8.astype(jnp.float32), axis=1, keepdims=True)
    row_scale = (1.0 / jnp.maximum(deg, 1.0)).astype(jnp.float32)      # (N, 1)
    feats_b = feats.astype(jnp.bfloat16)
    # Pre-transpose weights in the wrapper (free layout plumbing).
    w_enc_t = w_enc.T.astype(jnp.bfloat16)                             # (F, D)
    w_cls_pad = jnp.zeros((C_PAD, D), w_cls.dtype).at[:C].set(w_cls)
    w_cls_t = w_cls_pad.T.astype(jnp.bfloat16)                         # (D, C_PAD)

    # Hold feats fully resident in VMEM when small enough (single DMA, sliced
    # in-kernel); otherwise stream (tk, F) blocks driven by the schedule.
    feats_resident = (N * F * 2) <= 8 * 1024 * 1024
    if feats_resident:
        feats_spec = pl.BlockSpec((N, F), lambda i, k, c, ix: (0, 0))
        feats_vmem = N * F * 2
    else:
        feats_spec = pl.BlockSpec((tk, F), lambda i, k, c, ix: (ix[i, k], 0))
        feats_vmem = 2 * tk * F * 2

    grid = (N // tm, kmax)

    # VMEM budget (double-buffered streams + resident weights + scratch),
    # capped at 48 MiB so it is safe on v7x's 64 MiB VMEM.
    vmem_need = (2 * tm * tk * 1 + feats_vmem + 2 * tm * 4
                 + F * D * 2 + D * C_PAD * 2
                 + 2 * tm * C_PAD * 4 + tm * F * 4)
    vmem_limit = int(min(48 * 1024 * 1024, max(32 * 1024 * 1024, 2 * vmem_need)))

    cost = pl.CostEstimate(
        flops=2 * nnz_tiles * tm * tk * F + 2 * N * F * D + 2 * N * D * C_PAD,
        transcendentals=0,
        bytes_accessed=(nnz_tiles * tm * tk * 1                        # int8 adj tiles
                        + (N * F * 2 if feats_resident else nnz_tiles * tk * F * 2)
                        + N * 4                                        # row scale
                        + (F * D + D * C_PAD) * 2                      # weights
                        + N * C_PAD * 4),                              # output
    )

    kernel = functools.partial(_graphsage_kernel, tk=tk,
                               feats_resident=feats_resident)

    out_pad = pl.pallas_call(
        kernel,
        out_shape=jax.ShapeDtypeStruct((N, C_PAD), jnp.float32),
        grid_spec=pltpu.PrefetchScalarGridSpec(
            num_scalar_prefetch=2,
            grid=grid,
            in_specs=[
                # adjacency tile (tm, tk): only nonzero tiles are visited
                pl.BlockSpec((tm, tk), lambda i, k, c, ix: (i, ix[i, k])),
                feats_spec,
                # per-row mean-normalization scale, applied in the epilogue
                pl.BlockSpec((tm, 1), lambda i, k, c, ix: (i, 0)),
                # weights: resident in VMEM for the whole grid (DMA'd once)
                pl.BlockSpec((F, D), lambda i, k, c, ix: (0, 0)),
                pl.BlockSpec((D, C_PAD), lambda i, k, c, ix: (0, 0)),
            ],
            out_specs=pl.BlockSpec((tm, C_PAD), lambda i, k, c, ix: (i, 0)),
            scratch_shapes=[pltpu.VMEM((tm, F), jnp.float32)],
        ),
        compiler_params=pltpu.CompilerParams(
            dimension_semantics=("parallel", "arbitrary"),
            vmem_limit_bytes=vmem_limit,
        ),
        cost_estimate=cost,
    )(cnt, kidx, adj_i8, feats_b, row_scale, w_enc_t, w_cls_t)

    return out_pad[:, :C]


def xavier_uniform(key, shape):
    fan_out, fan_in = shape
    bound = (6.0 / (fan_in + fan_out)) ** 0.5
    return jax.random.uniform(key, shape, jnp.float32, -bound, bound)


if __name__ == "__main__":
    # nodes, feat_dim, embed_dim, num_classes (small, but a real multi-tile grid)
    N, F, D, C = 1024, 128, 128, 7
    COMM = 256   # community size -> block-clustered (tile-skippable) adjacency

    key = jax.random.PRNGKey(0)
    k_adj, k_cross, k_feat, k_enc, k_cls = jax.random.split(key, 5)

    feats = jax.random.normal(k_feat, (N, F), jnp.float32)

    # Block-clustered random graph: 5% density inside communities of COMM
    # nodes, a sparser band of cross edges between communities 1 and 2, plus
    # self loops. Off-community adjacency tiles are empty and get skipped.
    adj = jnp.zeros((N, N), jnp.float32)
    for c in range(N // COMM):
        blk = (jax.random.uniform(jax.random.fold_in(k_adj, c),
                                  (COMM, COMM)) < 0.05).astype(jnp.float32)
        adj = adj.at[c * COMM:(c + 1) * COMM, c * COMM:(c + 1) * COMM].set(blk)
    cross = (jax.random.uniform(k_cross, (COMM, COMM)) < 0.01).astype(jnp.float32)
    adj = adj.at[1 * COMM:2 * COMM, 2 * COMM:3 * COMM].set(cross)
    adj = jnp.maximum(adj, adj.T)                             # symmetric
    adj = jnp.maximum(adj, jnp.eye(N, dtype=jnp.float32))     # self loops

    w_enc = xavier_uniform(k_enc, (D, F))   # encoder weight (embed_dim x feat_dim)
    w_cls = xavier_uniform(k_cls, (C, D))   # SupervisedGraphSage.weight

    scores = supervised_graphsage_forward(adj, feats, w_enc, w_cls, tm=256, tk=256)
    scores = jax.block_until_ready(scores)
    assert scores.shape == (N, C)

    # Reference in plain JAX mirroring the kernel's bf16 casts (f32 accumulate).
    f32 = lambda x: x.astype(jnp.float32)
    deg = jnp.sum(adj, axis=1, keepdims=True)
    mask_b = f32(adj.astype(jnp.bfloat16))        # 0/1 -> exact in bf16
    feats_bf = f32(feats.astype(jnp.bfloat16))
    w_enc_bf = f32(w_enc.astype(jnp.bfloat16))
    w_cls_bf = f32(w_cls.astype(jnp.bfloat16))
    agg_ref = f32(((mask_b @ feats_bf) / deg).astype(jnp.bfloat16))
    emb_ref = f32(jnp.maximum(agg_ref @ w_enc_bf.T, 0.0).astype(jnp.bfloat16))
    ref = emb_ref @ w_cls_bf.T
    assert jnp.allclose(scores, ref, atol=2e-2, rtol=2e-2), (
        float(jnp.max(jnp.abs(scores - ref))))

    # Looser sanity check against full-f32 math (per review).
    agg_f = (adj @ feats) / deg
    emb_f = jnp.maximum(agg_f @ w_enc.T, 0.0)
    ref_f = emb_f @ w_cls.T
    assert jnp.allclose(scores, ref_f, atol=1e-1, rtol=1e-1), (
        float(jnp.max(jnp.abs(scores - ref_f))))

    print("KERNEL_OK")
</pallas_src>

<mosaic_0001>
module attributes {stable_mosaic.version = 11 : i64} {
  func.func @_graphsage_kernel(%arg0: i32, %arg1: i32, %arg2: memref<4xi32, #tpu.memory_space<smem>>, %arg3: memref<4x2xi32, #tpu.memory_space<smem>>, %arg4: memref<256x256xi8, #tpu.memory_space<vmem>>, %arg5: memref<1024x128xbf16, #tpu.memory_space<vmem>>, %arg6: memref<256x1xf32, #tpu.memory_space<vmem>>, %arg7: memref<128x128xbf16, #tpu.memory_space<vmem>>, %arg8: memref<128x128xbf16, #tpu.memory_space<vmem>>, %arg9: memref<256x128xf32, #tpu.memory_space<vmem>>, %arg10: memref<256x128xf32, #tpu.memory_space<vmem>>) attributes {dimension_semantics = [#tpu.dimension_semantics<parallel>, #tpu.dimension_semantics<arbitrary>], iteration_bounds = array<i64: 4, 2>, scalar_prefetch = 2 : i64, scratch_operands = 1 : i64, tpu.core_type = #tpu.core_type<tc>, window_params = [{transform_indices = @transform_0, window_bounds = array<i64: 256, 256>}, {pipeline_mode = #tpu.pipeline_mode<synchronous>, transform_indices = @transform_1, window_bounds = array<i64: 1024, 128>}, {transform_indices = @transform_2, window_bounds = array<i64: 256, 1>}, {pipeline_mode = #tpu.pipeline_mode<synchronous>, transform_indices = @transform_3, window_bounds = array<i64: 128, 128>}, {pipeline_mode = #tpu.pipeline_mode<synchronous>, transform_indices = @transform_4, window_bounds = array<i64: 128, 128>}, {transform_indices = @transform_5, window_bounds = array<i64: 256, 128>}]} {
    %0 = arith.index_cast %arg0 : i32 to index
    %1 = memref.load %arg2[%0] : memref<4xi32, #tpu.memory_space<smem>>
    %c0_i32 = arith.constant 0 : i32
    %2 = arith.cmpi eq, %arg1, %c0_i32 : i32
    %3 = arith.extui %2 : i1 to i32
    %c0_i32_0 = arith.constant 0 : i32
    %4 = arith.cmpi ne, %3, %c0_i32_0 : i32
    scf.if %4 {
      %cst = arith.constant 0.000000e+00 : f32
      %12 = vector.broadcast %cst : f32 to vector<256x128xf32>
      %c0 = arith.constant 0 : index
      %c0_3 = arith.constant 0 : index
      %13 = vector.load %arg10[%c0, %c0_3] : memref<256x128xf32, #tpu.memory_space<vmem>>, vector<256x128xf32>
      tpu.vector_store %arg10[%c0, %c0_3], %12 {strides = array<i32>} : memref<256x128xf32, #tpu.memory_space<vmem>>, vector<256x128xf32>,
    } else {
    }
    %5 = arith.cmpi slt, %arg1, %1 : i32
    %6 = arith.extui %5 : i1 to i32
    %c0_i32_1 = arith.constant 0 : i32
    %7 = arith.cmpi ne, %6, %c0_i32_1 : i32
    scf.if %7 {
      %c0 = arith.constant 0 : index
      %c0_3 = arith.constant 0 : index
      %12 = vector.load %arg4[%c0, %c0_3] : memref<256x256xi8, #tpu.memory_space<vmem>>, vector<256x256xi8>
      %13 = arith.sitofp %12 : vector<256x256xi8> to vector<256x256xbf16>
      %14 = arith.index_cast %arg0 : i32 to index
      %15 = arith.index_cast %arg1 : i32 to index
      %16 = memref.load %arg3[%14, %15] : memref<4x2xi32, #tpu.memory_space<smem>>
      %c256_i32 = arith.constant 256 : i32
      %17 = arith.muli %16, %c256_i32 : i32
      %18 = tpu.assume_multiple %17, 256 : i32
      %19 = arith.index_cast %18 : i32 to index
      %c0_4 = arith.constant 0 : index
      %20 = vector.load %arg5[%19, %c0_4] : memref<1024x128xbf16, #tpu.memory_space<vmem>>, vector<256x128xbf16>
      %c0_5 = arith.constant 0 : index
      %c0_6 = arith.constant 0 : index
      %21 = vector.load %arg10[%c0_5, %c0_6] : memref<256x128xf32, #tpu.memory_space<vmem>>, vector<256x128xf32>
      %cst = arith.constant dense<0.000000e+00> : vector<256x128xf32>
      %22 = tpu.matmul %13, %20, %cst {dimension_numbers = #tpu.dot_dimension_numbers<[1], [0], [0], [1], [0, 0, 1, 1], [], []>} : vector<256x256xbf16>, vector<256x128xbf16>, vector<256x128xf32> -> vector<256x128xf32>
      %23 = arith.addf %21, %22 : vector<256x128xf32>
      %c0_7 = arith.constant 0 : index
      %c0_8 = arith.constant 0 : index
      %24 = vector.load %arg10[%c0_7, %c0_8] : memref<256x128xf32, #tpu.memory_space<vmem>>, vector<256x128xf32>
      tpu.vector_store %arg10[%c0_7, %c0_8], %23 {strides = array<i32>} : memref<256x128xf32, #tpu.memory_space<vmem>>, vector<256x128xf32>,
    } else {
    }
    %c1_i32 = arith.constant 1 : i32
    %8 = arith.subi %1, %c1_i32 : i32
    %9 = arith.cmpi eq, %arg1, %8 : i32
    %10 = arith.extui %9 : i1 to i32
    %c0_i32_2 = arith.constant 0 : i32
    %11 = arith.cmpi ne, %10, %c0_i32_2 : i32
    scf.if %11 {
      %c0 = arith.constant 0 : index
      %c0_3 = arith.constant 0 : index
      %12 = vector.load %arg10[%c0, %c0_3] : memref<256x128xf32, #tpu.memory_space<vmem>>, vector<256x128xf32>
      %c0_4 = arith.constant 0 : index
      %c0_5 = arith.constant 0 : index
      %13 = vector.load %arg6[%c0_4, %c0_5] : memref<256x1xf32, #tpu.memory_space<vmem>>, vector<256x1xf32>
      %14 = vector.broadcast %13 : vector<256x1xf32> to vector<256x128xf32>
      %15 = arith.mulf %12, %14 : vector<256x128xf32>
      %16 = arith.truncf %15 : vector<256x128xf32> to vector<256x128xbf16>
      %c0_6 = arith.constant 0 : index
      %c0_7 = arith.constant 0 : index
      %17 = vector.load %arg7[%c0_6, %c0_7] : memref<128x128xbf16, #tpu.memory_space<vmem>>, vector<128x128xbf16>
      %cst = arith.constant dense<0.000000e+00> : vector<256x128xf32>
      %18 = tpu.matmul %16, %17, %cst {dimension_numbers = #tpu.dot_dimension_numbers<[1], [0], [0], [1], [0, 0, 1, 1], [], []>} : vector<256x128xbf16>, vector<128x128xbf16>, vector<256x128xf32> -> vector<256x128xf32>
      %cst_8 = arith.constant 0.000000e+00 : f32
      %19 = vector.broadcast %cst_8 : f32 to vector<256x128xf32>
      %20 = arith.maximumf %18, %19 : vector<256x128xf32>
      %21 = arith.truncf %20 : vector<256x128xf32> to vector<256x128xbf16>
      %c0_9 = arith.constant 0 : index
      %c0_10 = arith.constant 0 : index
      %22 = vector.load %arg8[%c0_9, %c0_10] : memref<128x128xbf16, #tpu.memory_space<vmem>>, vector<128x128xbf16>
      %cst_11 = arith.constant dense<0.000000e+00> : vector<256x128xf32>
      %23 = tpu.matmul %21, %22, %cst_11 {dimension_numbers = #tpu.dot_dimension_numbers<[1], [0], [0], [1], [0, 0, 1, 1], [], []>} : vector<256x128xbf16>, vector<128x128xbf16>, vector<256x128xf32> -> vector<256x128xf32>
      %c0_12 = arith.constant 0 : index
      %c0_13 = arith.constant 0 : index
      %24 = vector.load %arg9[%c0_12, %c0_13] : memref<256x128xf32, #tpu.memory_space<vmem>>, vector<256x128xf32>
      tpu.vector_store %arg9[%c0_12, %c0_13], %23 {strides = array<i32>} : memref<256x128xf32, #tpu.memory_space<vmem>>, vector<256x128xf32>,
    } else {
    }
    return
  }
  func.func @transform_0(%arg0: i32, %arg1: i32, %arg2: memref<4xi32, #tpu.memory_space<smem>>, %arg3: memref<4x2xi32, #tpu.memory_space<smem>>) -> (i32, i32) {
    %0 = arith.index_cast %arg0 : i32 to index
    %1 = arith.index_cast %arg1 : i32 to index
    %2 = memref.load %arg3[%0, %1] : memref<4x2xi32, #tpu.memory_space<smem>>
    %c0_i32 = arith.constant 0 : i32
    return %arg0, %2 : i32, i32
  }
  func.func @transform_1(%arg0: i32, %arg1: i32, %arg2: memref<4xi32, #tpu.memory_space<smem>>, %arg3: memref<4x2xi32, #tpu.memory_space<smem>>) -> (i32, i32) {
    %c0_i32 = arith.constant 0 : i32
    %c0_i32_0 = arith.constant 0 : i32
    %c0_i32_1 = arith.constant 0 : i32
    return %c0_i32, %c0_i32_0 : i32, i32
  }
  func.func @transform_2(%arg0: i32, %arg1: i32, %arg2: memref<4xi32, #tpu.memory_space<smem>>, %arg3: memref<4x2xi32, #tpu.memory_space<smem>>) -> (i32, i32) {
    %c0_i32 = arith.constant 0 : i32
    %c0_i32_0 = arith.constant 0 : i32
    return %arg0, %c0_i32 : i32, i32
  }
  func.func @transform_3(%arg0: i32, %arg1: i32, %arg2: memref<4xi32, #tpu.memory_space<smem>>, %arg3: memref<4x2xi32, #tpu.memory_space<smem>>) -> (i32, i32) {
    %c0_i32 = arith.constant 0 : i32
    %c0_i32_0 = arith.constant 0 : i32
    %c0_i32_1 = arith.constant 0 : i32
    return %c0_i32, %c0_i32_0 : i32, i32
  }
  func.func @transform_4(%arg0: i32, %arg1: i32, %arg2: memref<4xi32, #tpu.memory_space<smem>>, %arg3: memref<4x2xi32, #tpu.memory_space<smem>>) -> (i32, i32) {
    %c0_i32 = arith.constant 0 : i32
    %c0_i32_0 = arith.constant 0 : i32
    %c0_i32_1 = arith.constant 0 : i32
    return %c0_i32, %c0_i32_0 : i32, i32
  }
  func.func @transform_5(%arg0: i32, %arg1: i32, %arg2: memref<4xi32, #tpu.memory_space<smem>>, %arg3: memref<4x2xi32, #tpu.memory_space<smem>>) -> (i32, i32) {
    %c0_i32 = arith.constant 0 : i32
    %c0_i32_0 = arith.constant 0 : i32
    return %arg0, %c0_i32 : i32, i32
  }
}

</mosaic_0001>

<bundles_post_ra>
// kernel: tpu_custom_call.1
= control target key start
LH: loop header
LB: loop body
LE: loop exit
PB: predicated region body
PF: predicated region fallthrough
CT: control target
= control target key end

     0   :  { %s2882_s0 = inlined_call_operand.vmem [shape: s32[4], index: 0, kind: input, shape index: {}]   ;;  %s2883_s2 = inlined_call_operand.hbm [shape: s8[1024,1024], index: 2, kind: input, shape index: {}]   ;;  %s2884_s3 = inlined_call_operand.vmem [shape: bf16[1024,128], index: 3, kind: input, shape index: {}]   ;;  %s2885_s4 = inlined_call_operand.vmem [shape: f32[1024,1], index: 4, kind: input, shape index: {}]   ;;  %s2886_s5 = inlined_call_operand.vmem [shape: bf16[128,128], index: 5, kind: input, shape index: {}]   ;;  %s2887_s6 = inlined_call_operand.vmem [shape: bf16[128,128], index: 6, kind: input, shape index: {}]   ;;  %s2888_s7 = inlined_call_operand.hbm [shape: f32[1024,128], index: 7, kind: output, shape index: {}]   ;;  %s2889_s1 = inlined_call_operand.vmem [shape: s32[4,2], index: 1, kind: input, shape index: {}]  }
   0x1   :  { %s12_s26 = sshll.u32 %s2882_s0, 4  ;;  %s16_s29 = sshll.u32 %s2889_s1, 4  ;;  %s13_s26 = int_to_ptr.vmem [resolvable:$true] %s12_s26  ;;  %s17_s29 = int_to_ptr.vmem [resolvable:$true] %s16_s29 }
   0x2   :  { %s2223_s30 = scalar_lea.vmem %s13_s26, 16  ;;  %p2228_p1 = scmp.lt.s32.totalorder %s13_s26, %s13_s26 }
   0x3   :  { %p2224_p0 = scmp.ne.s32.totalorder %s13_s26, %s2223_s30  ;;  %p2229_p2 = scmp.lt.s32.totalorder %s2223_s30, %s2223_s30 }
   0x5   :  { %p2230_p3 = por %p2229_p2, %p2228_p1 }
   0x7   :  { %p2231_p4 = pnand %p2230_p3, %p2224_p0 }
   0x9   :  { %2234 = shalt.err (!%p2231_p4)  }
   0xa   :  { %s2403_s8 = smov [#allocation4]   ;;  %s2235_s9 = scalar_lea.vmem %s17_s29, 64 }
   0xb   :  { %15 = dma.vmem_to_smem %s13_s26, 16, %s2403_s8, [#allocation3] }
   0xc   :  { %p2236_p5 = scmp.ne.s32.totalorder %s17_s29, %s2235_s9  ;;  %p2240_p6 = scmp.lt.s32.totalorder %s17_s29, %s17_s29 }
   0xd   :  { %p2241_p7 = scmp.lt.s32.totalorder %s2235_s9, %s2235_s9 }
   0xf   :  { %p2242_p8 = por %p2241_p7, %p2240_p6 }
  0x11   :  { %p2243_p9 = pnand %p2242_p8, %p2236_p5 }
  0x13   :  { %2246 = shalt.err (!%p2243_p9)  }
  0x14   :  { %s2404_s0 = smov [#allocation5]  }
  0x15   :  { %19 = dma.vmem_to_smem %s17_s29, 64, %s2404_s0, [#allocation3] }
  0x16   :  { %2349 = dma.done.wait [#allocation3], 80 }
  0x17   :  { %2350 = vsyncadd [#allocation3], 4294967216 }
  0x18   :  { %21 = sfence }
  0x19   :  { %22 = vsyncpa [#allocation7], 0 }
  0x1a   :  { %24 = vsyncpa [#allocation7 + $0x1], 0 }
  0x1b   :  { %25 = vsyncpa [#allocation8], 0 }
  0x1c   :  { %27 = vsyncpa [#allocation8 + $0x1], 0  ;;  %s2460_s1 = smov 0   ;;  %s2462_s10 = smov 0  }
  0x1d   :  { %s2464_s11 = smov 0   ;;  %s2466_s12 = smov 0  }
  0x1e   :  { %s2468_s13 = smov 0   ;;  %s2470_s14 = smov 0  }
  0x1f   :  { %s2472_s15 = smov 0   ;;  %s2474_s16 = smov 0  }
  0x20   :  { %s2476_s17 = smov 0   ;;  %s2478_s18 = smov 0  }
  0x21   :  { %s2480_s19 = smov 0  }
  0x22 LB: > { %2898 = sst [smem:[#allocation15_spill]] %s2369_s11  ;;  %s1739_s20 = sadd.s32 4294967295, %s2401_s19   ;;  %s2401_s19 = sphi %s2480_s19, %s33_s19   ;;  %s2397_s18 = sphi %s2478_s18, %s2927_s18   ;;  %s2393_s17 = sphi %s2476_s17, %s2920_s17   ;;  %s2389_s16 = sphi %s2474_s16, %s2926_s16   ;;  %s2385_s15 = sphi %s2472_s15, %s2919_s15   ;;  %s2381_s14 = sphi %s2470_s14, %s2918_s14   ;;  %s2377_s13 = sphi %s2468_s13, %s2925_s13   ;;  %s2373_s12 = sphi %s2466_s12, %s2924_s12   ;;  %s2369_s11 = sphi %s2464_s11, %s2916_s11   ;;  %s2365_s10 = sphi %s2462_s10, %s2923_s10   ;;  %s2361_s1 = sphi %s2460_s1, %s2922_s1  }
  0x23   : > { %2899 = sst [smem:[#allocation16_spill]] %s2381_s14  ;;  %s42_s21 = sadd.s32 1, %s2393_s17 }
  0x24   : > { %2900 = sst [smem:[#allocation17_spill]] %s2393_s17  ;;  %s45_s22 = sadd.s32 1, %s2397_s18 }
  0x25   : > { %p43_p10 = scmp.ge.s32.totalorder %s42_s21, 2  ;;  %s49_s23 = sshra.s32 %s2393_s17, 7 }
  0x26   : > { %s51_s24 = sadd.s32 %s2397_s18, %s49_s23  ;;  %s54_s25 = sand.u32 127, %s2393_s17 }
  0x27   : > { %s2929_s21 = smov (%p43_p10, %s42_s21), 0  ;;  %s2931_s22 = smov (!%p43_p10, %s45_s22), %s2397_s18 }
  0x28   : > { %2901 = sst [smem:[#allocation18_spill]] %s2929_s21  ;;  %s1740_s26 = sadd.s32 4294967294, %s2401_s19  }
  0x29   : > { %s1741_s27 = sshll.u32 %s51_s24, 7  ;;  %p47_p11 = scmp.ge.s32.totalorder %s2931_s22, 4 }
  0x2a   : > { %s2525_s28 = sadd.s32 %s1741_s27, %s54_s25  ;;  %s57_s30 = sshra.s32 %s2929_s21, 7 }
  0x2b   : > { %s56_s29 = sld [smem:[#allocation5 + %s2525_s28]]  ;;  %s2933_s22 = smov (%p47_p11, %s2931_s22), 0 }
  0x2c   : > { %2902 = sst [smem:[#allocation19_spill]] %s2933_s22  ;;  %s62_s8 = sand.u32 127, %s2929_s21 }
  0x2d   : > { %s70_s9 = sadd.s32 1, %s2381_s14  ;;  %s59_s0 = sadd.s32 %s57_s30, %s2933_s22 }
  0x2e   : > { %p77_p12 = scmp.ne.s32.totalorder %s2381_s14, %s2377_s13  ;;  %s1742_s23 = sshll.u32 %s59_s0, 7 }
  0x2f   : > { %s65_s24 = ssub.s32 %s2397_s18, %s2933_s22  ;;  %s63_s25 = sadd.s32 %s1742_s23, %s62_s8 }
  0x30   : > { %p83_p13 = scmp.ne.s32.totalorder %s2377_s13, %s2373_s12  ;;  %s64_s27 = sld [smem:[#allocation5 + %s63_s25]] }
  0x31   : > { %p78_p0 = scmp.eq.s32.totalorder %s2401_s19, 0  ;;  %p84_p1 = scmp.eq.s32.totalorder %s1739_s20, 0 }
  0x32   : > { %p183_p2 = scmp.eq.s32.totalorder %s65_s24, 0  ;;  %s185_s21 = sadd.s32 1, %s2369_s11 }
  0x33   : > { %p195_p3 = scmp.ne.s32.totalorder %s2369_s11, %s2365_s10  ;;  %p2546_p4 = por %p84_p1, %p83_p13 }
  0x34   : > { %p196_p5 = scmp.eq.s32.totalorder %s1739_s20, 7  ;;  %p201_p7 = scmp.ne.s32.totalorder %s2365_s10, %s2361_s1 }
  0x35   : > { %s2903_s30 = scalar_select %p2546_p4, 1, 0 }
  0x36   : > { %s2553_s12 = scalar_select %p183_p2, %s2369_s11, %s185_s21  }
  0x37   : > { %p2555_p6 = por %p196_p5, %p195_p3  ;;  %s66_s0 = ssub.s32 %s56_s29, %s64_s27 }
  0x38   : > { %2904 = sst [smem:[#allocation20_spill]] %s2553_s12  ;;  %p202_p8 = scmp.eq.s32.totalorder %s1740_s26, 7 }
  0x39   : > { %s2905_s8 = scalar_select %p2555_p6, 1, 0 }
  0x3a   : > { %s67_s23 = sor.u32 %s66_s0, %s65_s24  ;;  %p2561_p10 = por %p202_p8, %p201_p7 }
  0x3b   : > { %p68_p9 = scmp.eq.s32.totalorder %s67_s23, 0  ;;  %p79_p11 = por %p78_p0, %p77_p12 }
  0x3c   : > { %s2906_s25 = scalar_select %p2561_p10, 1, 0 }
  0x3d   : > { %s231_s20 = sand.u32 1, %s2381_s14   ;;  %p2090_p13 = scmp.lt.s32.totalorder %s2401_s19, 8 }
  0x3e   : > { %2907 = sst [smem:[#allocation21_spill]] %s2906_s25  ;;  %s1745_s22 = sshll.u32 %s231_s20, 7 }
  0x3f   : > { %s2572_s21 = scalar_select %p68_p9, %s2381_s14, %s70_s9  }
  0x40   : > { %s2074_s17 = scalar_select %p79_p11, [#allocation5], [#allocation10] }
  0x41   : > { %2908 = sst [smem:[#allocation22_spill]] %s2572_s21  ;;  %s2935_s28 = smov (!%p79_p11, %s2525_s28), 0 }
  0x42   : > { %s2937_s17 = smov (!%p2090_p13, %s2074_s17), [#allocation11]  ;;  %s2939_s28 = smov (!%p2090_p13, %s2935_s28), 0 }
  0x43   : > { %p2576_p1 = pnand %p2090_p13, %p79_p11  ;;  %s243_s29 = sld [smem:[%s2937_s17 + %s2939_s28]] }
  0x44   : > { %s235_s24 = scalar_lea.vmem [#allocation6], %s1745_s22  ;;  %p1751_p2 = scmp.ge.s32.totalorder %s2401_s19, 1 }
  0x45   : > { %s253_s27 = sshll.u32 %s235_s24, 4  ;;  %p270_p12 = scmp.lt.s32.totalorder %s2401_s19, 9  ;;  %s2583_s27 = int_to_ptr.vmem [resolvable:$true] %s253_s27 }
  0x46   : > { %s1800_s0 = sshll.u32 %s2397_s18, 6  ;;  %s2594_s17 = scalar_lea.sflag [#allocation7], %s231_s20 }
  0x47   : > { %p2585_p0 = pnand %p1751_p2, %p270_p12  ;;  %p2249_p5 = pneg %p2576_p1 }
  0x48   : > { %s2252_s11 = scalar_lea.hbm %s2883_s2, 32768 }
  0x49   : > { %s1748_s23 = sshll.u32 %s243_s29, 1 }
  0x4a   : > { %s250_s21 = sadd.s32 %s1800_s0, %s1748_s23 }
  0x4b   : > { %s1750_s14 = sshll.u32 %s250_s21, 7 }
  0x4c   : > { %s2592_s25 = scalar_lea.hbm %s2883_s2, %s1750_s14 }
  0x4d   : > { %s2247_s22 = scalar_lea.hbm %s2592_s25, 2048  ;;  %p2253_p9 = scmp.lt.u32.totalorder %s2592_s25, %s2883_s2 }
  0x4e   : > { %p2248_p3 = scmp.ne.s32.totalorder %s2592_s25, %s2247_s22  ;;  %p2254_p11 = scmp.lt.u32.totalorder %s2252_s11, %s2247_s22 }
  0x4f   : > { %p2256_p2 = scmp.lt.u32.totalorder %s2247_s22, %s2592_s25 }
  0x50   : > { %p2250_p7 = pnand %p2249_p5, %p2248_p3  ;;  %p2255_p13 = por %p2254_p11, %p2253_p9 }
  0x52   : > { %p2251_p8 = pneg %p2250_p7  ;;  %p2257_p12 = por %p2256_p2, %p2255_p13 }
  0x54   : > { %p2258_p10 = pnand %p2257_p12, %p2251_p8 }
  0x56   : > { %2261 = shalt.err (!%p2258_p10)
}
  0x57   : > { %s2262_s20 = scalar_lea.vmem %s2583_s27, 2048  ;;  %s2405_s29 = smov [#allocation6]  }
  0x58   : > { %p2263_p3 = scmp.ne.s32.totalorder %s2583_s27, %s2262_s20  ;;  %s2267_s24 = sshll.u32 %s2405_s29, 4  ;;  %s2268_s24 = int_to_ptr.vmem [resolvable:$false] %s2267_s24 }
  0x59   : > { %s2269_s0 = scalar_lea.vmem %s2268_s24, 4096  ;;  %p2270_p4 = scmp.lt.s32.totalorder %s2583_s27, %s2268_s24 }
  0x5a   : > { %p2265_p7 = pnand %p2263_p3, %p2249_p5  ;;  %p2271_p9 = scmp.lt.s32.totalorder %s2269_s0, %s2262_s20 }
  0x5c   : > { %p2266_p6 = pneg %p2265_p7  ;;  %p2272_p11 = por %p2271_p9, %p2270_p4 }
  0x5e   : > { %p2273_p13 = pnand %p2272_p11, %p2266_p6 }
  0x60   : > { %2276 = shalt.err (!%p2273_p13)
}
  0x61   : > { %s2406_s23 = smov 1024   ;;  %s2407_s22 = smov 256  }
  0x62   : > { %s2408_s28 = smov 16   ;;  %274 = sbr.rel (%p2585_p0) target bundleno = 1110 (0x456), region = 40 }
  0x63   : > { %2085 = dma.hbm_to_vmem [thread:$0]  (!%p2576_p1), %s2592_s25, 2048, %s2583_s27, %s2594_s17, %s2406_s23, %s2407_s22, %s2408_s28  }
  0x64   : > { %s276_s21 = sand.u32 (!%p2585_p0), 1, %s2377_s13   ;;  %p2911_p4 = scmp.ne.s32.totalorder (!%p2585_p0), %s2903_s30, 0 }
  0x65   : > { %s1752_s11 = sshll.u32 (!%p2585_p0), %s276_s21, 7  ;;  %s277_s14 = scalar_lea.sflag (!%p2585_p0), [#allocation7], %s276_s21 }
  0x66   : > { %s2625_s12 = scalar_lea.vmem (!%p2585_p0), [#allocation6], %s1752_s11 }
  0x69   : > { %2352 = dma.done.wait (%p2911_p4), %s277_s14, 2048  }
  0x6a   : > { %2354 = vsyncadd (%p2911_p4), %s277_s14, 4294965248  ;;  %s309_s25 = sand.u32 1, %s2365_s10   ;;  %s1754_s26 = sshll.u32 %s2389_s16, 5 }
  0x6b   : > { %s2634_s27 = sld [smem:[#allocation4 + %s2389_s16]]  ;;  %s1753_s9 = sshll.u32 %s309_s25, 8 }
  0x6c   : > { %p323_p6 = scmp.lt.s32.totalorder %s1754_s26, 127  ;;  %s2643_s30 = scalar_lea.vmem [#allocation9], %s1753_s9 }
  0x6d   : > { %p1756_p10 = scmp.ne.s32.totalorder %s2385_s15, 0 }
  0x6e   : > { %s2941_s26 = smov (!%p323_p6, %s1754_s26), 127  ;;  %v2409_v0 = vmov (!%p1756_p10), 0.0  }
  0x6f   : > { %s1755_s17 = sshll.u32 %s2941_s26, 3  ;;  %334 = sbr.rel (%p1756_p10) target bundleno = 127 (0x7f), region = 48  ;;  %335 = vst [vmem:[#allocation2] sm:$0xff] (!%p1756_p10), %v2409_v0  ;;  %336 = vst [vmem:[#allocation2 + $0x8] sm:$0xff] (!%p1756_p10), %v2409_v0 }
  0x70   : > { %s2641_s24 = scalar_lea.vmem %s2885_s4, %s1755_s17  ;;  %337 = vst [vmem:[#allocation2 + $0x10] sm:$0xff] (!%p1756_p10), %v2409_v0  ;;  %338 = vst [vmem:[#allocation2 + $0x18] sm:$0xff] (!%p1756_p10), %v2409_v0 }
  0x71   : > { %339 = vst [vmem:[#allocation2 + $0x20] sm:$0xff] (!%p1756_p10), %v2409_v0  ;;  %340 = vst [vmem:[#allocation2 + $0x28] sm:$0xff] (!%p1756_p10), %v2409_v0 }
  0x72   : > { %341 = vst [vmem:[#allocation2 + $0x30] sm:$0xff] (!%p1756_p10), %v2409_v0  ;;  %342 = vst [vmem:[#allocation2 + $0x38] sm:$0xff] (!%p1756_p10), %v2409_v0 }
  0x73   : > { %343 = vst [vmem:[#allocation2 + $0x40] sm:$0xff] (!%p1756_p10), %v2409_v0  ;;  %344 = vst [vmem:[#allocation2 + $0x48] sm:$0xff] (!%p1756_p10), %v2409_v0 }
  0x74   : > { %345 = vst [vmem:[#allocation2 + $0x50] sm:$0xff] (!%p1756_p10), %v2409_v0  ;;  %346 = vst [vmem:[#allocation2 + $0x58] sm:$0xff] (!%p1756_p10), %v2409_v0 }
  0x75   : > { %347 = vst [vmem:[#allocation2 + $0x60] sm:$0xff] (!%p1756_p10), %v2409_v0  ;;  %348 = vst [vmem:[#allocation2 + $0x68] sm:$0xff] (!%p1756_p10), %v2409_v0 }
  0x76   : > { %349 = vst [vmem:[#allocation2 + $0x70] sm:$0xff] %v2409_v0  ;;  %350 = vst [vmem:[#allocation2 + $0x78] sm:$0xff] %v2409_v0 }
  0x77   : > { %351 = vst [vmem:[#allocation2 + $0x80] sm:$0xff] %v2409_v0  ;;  %352 = vst [vmem:[#allocation2 + $0x88] sm:$0xff] %v2409_v0 }
  0x78   : > { %353 = vst [vmem:[#allocation2 + $0x90] sm:$0xff] %v2409_v0  ;;  %354 = vst [vmem:[#allocation2 + $0x98] sm:$0xff] %v2409_v0 }
  0x79   : > { %355 = vst [vmem:[#allocation2 + $0xa0] sm:$0xff] %v2409_v0  ;;  %356 = vst [vmem:[#allocation2 + $0xa8] sm:$0xff] %v2409_v0 }
  0x7a   : > { %357 = vst [vmem:[#allocation2 + $0xb0] sm:$0xff] %v2409_v0  ;;  %358 = vst [vmem:[#allocation2 + $0xb8] sm:$0xff] %v2409_v0 }
  0x7b   : > { %359 = vst [vmem:[#allocation2 + $0xc0] sm:$0xff] %v2409_v0  ;;  %360 = vst [vmem:[#allocation2 + $0xc8] sm:$0xff] %v2409_v0 }
  0x7c   : > { %361 = vst [vmem:[#allocation2 + $0xd0] sm:$0xff] %v2409_v0  ;;  %362 = vst [vmem:[#allocation2 + $0xd8] sm:$0xff] %v2409_v0 }
  0x7d   : > { %363 = vst [vmem:[#allocation2 + $0xe0] sm:$0xff] %v2409_v0  ;;  %364 = vst [vmem:[#allocation2 + $0xe8] sm:$0xff] %v2409_v0 }
  0x7e   : > { %365 = vst [vmem:[#allocation2 + $0xf0] sm:$0xff] %v2409_v0  ;;  %366 = vst [vmem:[#allocation2 + $0xf8] sm:$0xff] %v2409_v0 }
  0x7f PF: > { %p1757_p1 = scmp.ge.s32.totalorder %s2385_s15, %s2634_s27 }
  0x80   : > { %s419_s0 = sshra.s32 (!%p1757_p1), %s2385_s15, 7  ;;  %s424_s23 = sand.u32 (!%p1757_p1), 127, %s2385_s15  ;;  %v2651_v1 = vld [vmem:[%s2625_s12 + $0x8] sm:$0xff] (!%p1757_p1)  ;;  %v371_v21 = vld [vmem:[%s2625_s12] sm:$0xff] (!%p1757_p1)  ;;  %v374_v27 = vld [vmem:[%s2625_s12 + $0x18] sm:$0xff] (!%p1757_p1) }
  0x81   : > { %370 = sbr.rel (%p1757_p1) target bundleno = 451 (0x1c3), region = 52  ;;  %v2654_v2 = vld [vmem:[%s2625_s12 + $0x48] sm:$0xff] (!%p1757_p1)  ;;  %s421_s22 = sadd.s32 (!%p1757_p1), %s2389_s16, %s419_s0  ;;  %v388_v3 = vunpack.c.l.s8.bf16 (!%p1757_p1), %v2651_v1  ;;  %v379_v22 = vld [vmem:[%s2625_s12 + $0x40] sm:$0xff] (!%p1757_p1)  ;;  %v387_v23 = vunpack.c.l.s8.bf16 (!%p1757_p1), %v371_v21  ;;  %v390_v25 = vunpack.c.h.s8.bf16 (!%p1757_p1), %v2651_v1  ;;  %v382_v28 = vld [vmem:[%s2625_s12 + $0x58] sm:$0xff] (!%p1757_p1)  ;;  %v389_v29 = vunpack.c.h.s8.bf16 (!%p1757_p1), %v371_v21 }
  0x82   : > { %v404_v4 = vunpack.c.l.s8.bf16 (!%p1757_p1), %v2654_v2  ;;  %s1758_s28 = sshll.u32 (!%p1757_p1), %s421_s22, 7  ;;  %v403_v24 = vunpack.c.l.s8.bf16 (!%p1757_p1), %v379_v22  ;;  %v406_v26 = vunpack.c.h.s8.bf16 (!%p1757_p1), %v2654_v2  ;;  %v405_v30 = vunpack.c.h.s8.bf16 (!%p1757_p1), %v379_v22  ;;  %v373_v33 = vld [vmem:[%s2625_s12 + $0x10] sm:$0xff] (!%p1757_p1)  ;;  %v376_v39 = vld [vmem:[%s2625_s12 + $0x28] sm:$0xff] (!%p1757_p1)  ;;  %v375_v45 = vld [vmem:[%s2625_s12 + $0x20] sm:$0xff] (!%p1757_p1) }
  0x83   : > { %s425_s21 = sadd.s32 (!%p1757_p1), %s1758_s28, %s424_s23  ;;  %624 = vmatprep.mubr.bf16.mxu0 (!%p1757_p1), %v388_v3  ;;  %v392_v31 = vunpack.c.l.s8.bf16 (!%p1757_p1), %v374_v27  ;;  %v408_v32 = vunpack.c.l.s8.bf16 (!%p1757_p1), %v382_v28  ;;  %v381_v34 = vld [vmem:[%s2625_s12 + $0x50] sm:$0xff] (!%p1757_p1)  ;;  %v391_v35 = vunpack.c.l.s8.bf16 (!%p1757_p1), %v373_v33  ;;  %v394_v37 = vunpack.c.h.s8.bf16 (!%p1757_p1), %v374_v27  ;;  %v384_v40 = vld [vmem:[%s2625_s12 + $0x68] sm:$0xff] (!%p1757_p1)  ;;  %v383_v46 = vld [vmem:[%s2625_s12 + $0x60] sm:$0xff] (!%p1757_p1) }
  0x84   : > { %688 = vmatprep.mubr.bf16.mxu1 (!%p1757_p1), %v404_v4  ;;  %s426_s11 = sld [smem:[#allocation5 + %s425_s21]] (!%p1757_p1)  ;;  %v407_v36 = vunpack.c.l.s8.bf16 (!%p1757_p1), %v381_v34  ;;  %v410_v38 = vunpack.c.h.s8.bf16 (!%p1757_p1), %v382_v28  ;;  %v393_v41 = vunpack.c.h.s8.bf16 (!%p1757_p1), %v373_v33  ;;  %v409_v42 = vunpack.c.h.s8.bf16 (!%p1757_p1), %v381_v34  ;;  %v378_v51 = vld [vmem:[%s2625_s12 + $0x38] sm:$0xff] (!%p1757_p1)  ;;  %v377_v57 = vld [vmem:[%s2625_s12 + $0x30] sm:$0xff] (!%p1757_p1)  ;;  %v464_v3 = vld [vmem:[#allocation2] sm:$0xff] (!%p1757_p1) }
  0x85   : > { %v396_v43 = vunpack.c.l.s8.bf16 (!%p1757_p1), %v376_v39  ;;  %v412_v44 = vunpack.c.l.s8.bf16 (!%p1757_p1), %v384_v40  ;;  %v395_v47 = vunpack.c.l.s8.bf16 (!%p1757_p1), %v375_v45  ;;  %v411_v48 = vunpack.c.l.s8.bf16 (!%p1757_p1), %v383_v46  ;;  %v386_v52 = vld [vmem:[%s2625_s12 + $0x78] sm:$0xff] (!%p1757_p1)  ;;  %v385_v58 = vld [vmem:[%s2625_s12 + $0x70] sm:$0xff] (!%p1757_p1) }
  0x86   : > { %v398_v49 = vunpack.c.h.s8.bf16 (!%p1757_p1), %v376_v39  ;;  %v414_v50 = vunpack.c.h.s8.bf16 (!%p1757_p1), %v384_v40  ;;  %v397_v53 = vunpack.c.h.s8.bf16 (!%p1757_p1), %v375_v45  ;;  %v413_v54 = vunpack.c.h.s8.bf16 (!%p1757_p1), %v383_v46  ;;  %v483_v33 = vld [vmem:[#allocation2 + $0x98] sm:$0xff] (!%p1757_p1)  ;;  %v484_v45 = vld [vmem:[#allocation2 + $0xa0] sm:$0xff] (!%p1757_p1) }
  0x87   : > { %v400_v55 = vunpack.c.l.s8.bf16 (!%p1757_p1), %v378_v51  ;;  %v416_v56 = vunpack.c.l.s8.bf16 (!%p1757_p1), %v386_v52  ;;  %v399_v59 = vunpack.c.l.s8.bf16 (!%p1757_p1), %v377_v57  ;;  %v415_v60 = vunpack.c.l.s8.bf16 (!%p1757_p1), %v385_v58 }
  0x88   : > { %v402_v61 = vunpack.c.h.s8.bf16 %v378_v51  ;;  %v418_v62 = vunpack.c.h.s8.bf16 %v386_v52  ;;  %v401_v63 = vunpack.c.h.s8.bf16 %v377_v57  ;;  %v417_v0 = vunpack.c.h.s8.bf16 %v385_v58  ;;  %v469_v51 = vld [vmem:[#allocation2 + $0x28] sm:$0xff] }
  0x8a   : > { %s1759_s14 = sshll.u32 %s426_s11, 8 }
  0x8b   : > { %s428_s26 = sshra.s32 %s1759_s14, 3 }
  0x8c   : > { %s1760_s9 = sshll.u32 %s428_s26, 2 }
  0x8d   : > { %s2662_s29 = scalar_lea.vmem %s2884_s3, %s1760_s9 }
  0x8e   : > { %v2189_v5 = vld [vmem:[%s2662_s29 + $0x40] sm:$0xff]   ;;  %v2191_v7 = vld [vmem:[%s2662_s29 + $0x48] sm:$0xff]   ;;  %v2193_v9 = vld [vmem:[%s2662_s29 + $0x50] sm:$0xff]  }
  0x8f   : > { %v2190_v6 = vld [vmem:[%s2662_s29] sm:$0xff]   ;;  %1802 = vmatprep.subr.bf16.mxu0 %v2189_v5  ;;  %2058 = vmatprep.subr.bf16.mxu1 %v2189_v5  ;;  %v2192_v8 = vld [vmem:[%s2662_s29 + $0x8] sm:$0xff]   ;;  %v2194_v10 = vld [vmem:[%s2662_s29 + $0x10] sm:$0xff]  }
  0x90   : > { %1803 = vmatpush3.bf16.msra.mxu0 %v2190_v6  ;;  %2066 = vmatpush3.bf16.msra.mxu1 %v2190_v6  ;;  %v2195_v11 = vld [vmem:[%s2662_s29 + $0x58] sm:$0xff]   ;;  %v2197_v13 = vld [vmem:[%s2662_s29 + $0x60] sm:$0xff]   ;;  %v2199_v15 = vld [vmem:[%s2662_s29 + $0x68] sm:$0xff]  }
  0x91   : > { %1804 = vmatprep.subr.bf16.mxu0 %v2191_v7  ;;  %2059 = vmatprep.subr.bf16.mxu1 %v2191_v7  ;;  %v2196_v12 = vld [vmem:[%s2662_s29 + $0x18] sm:$0xff]   ;;  %v2198_v14 = vld [vmem:[%s2662_s29 + $0x20] sm:$0xff]   ;;  %v2200_v16 = vld [vmem:[%s2662_s29 + $0x28] sm:$0xff]  }
  0x92   : > { %v2201_v17 = vld [vmem:[%s2662_s29 + $0x70] sm:$0xff]   ;;  %v2203_v19 = vld [vmem:[%s2662_s29 + $0x78] sm:$0xff]   ;;  %v480_v5 = vld [vmem:[#allocation2 + $0x80] sm:$0xff] }
  0x93   : > { %v2202_v18 = vld [vmem:[%s2662_s29 + $0x30] sm:$0xff]   ;;  %v2204_v20 = vld [vmem:[%s2662_s29 + $0x38] sm:$0xff]  }
  0x94   : > { %1805 = vmatpush3.bf16.msra.mxu0 %v2192_v8  ;;  %2067 = vmatpush3.bf16.msra.mxu1 %v2192_v8 }
  0x95   : > { %1806 = vmatprep.subr.bf16.mxu0 %v2193_v9  ;;  %2060 = vmatprep.subr.bf16.mxu1 %v2193_v9 }
  0x98   : > { %1807 = vmatpush3.bf16.msra.mxu0 %v2194_v10  ;;  %2068 = vmatpush3.bf16.msra.mxu1 %v2194_v10 }
  0x99   : > { %1808 = vmatprep.subr.bf16.mxu0 %v2195_v11  ;;  %2061 = vmatprep.subr.bf16.mxu1 %v2195_v11  ;;  %v465_v11 = vld [vmem:[#allocation2 + $0x8] sm:$0xff] }
  0x9c   : > { %1809 = vmatpush3.bf16.msra.mxu0 %v2196_v12  ;;  %2069 = vmatpush3.bf16.msra.mxu1 %v2196_v12 }
  0x9d   : > { %1810 = vmatprep.subr.bf16.mxu0 %v2197_v13  ;;  %2062 = vmatprep.subr.bf16.mxu1 %v2197_v13  ;;  %v481_v13 = vld [vmem:[#allocation2 + $0x88] sm:$0xff] }
  0xa0   : > { %1811 = vmatpush3.bf16.msra.mxu0 %v2198_v14  ;;  %2070 = vmatpush3.bf16.msra.mxu1 %v2198_v14 }
  0xa1   : > { %1812 = vmatprep.subr.bf16.mxu0 %v2199_v15  ;;  %2063 = vmatprep.subr.bf16.mxu1 %v2199_v15 }
  0xa4   : > { %1813 = vmatpush3.bf16.msra.mxu0 %v2200_v16  ;;  %2071 = vmatpush3.bf16.msra.mxu1 %v2200_v16 }
  0xa5   : > { %1814 = vmatprep.subr.bf16.mxu0 %v2201_v17  ;;  %2064 = vmatprep.subr.bf16.mxu1 %v2201_v17 }
  0xa8   : > { %1815 = vmatpush3.bf16.msra.mxu0 %v2202_v18  ;;  %2072 = vmatpush3.bf16.msra.mxu1 %v2202_v18 }
  0xa9   : > { %1816 = vmatprep.subr.bf16.mxu0 %v2203_v19  ;;  %2065 = vmatprep.subr.bf16.mxu1 %v2203_v19 }
  0xac   : > { %1817 = vmatpush3.bf16.msra.mxu0 %v2204_v20  ;;  %2073 = vmatpush3.bf16.msra.mxu1 %v2204_v20 }
  0xaf   : > { %625 = vmatmul.mubr.bf16.vlgmr.msra.gmra.mrb[0].mxu0 %v387_v23  ;;  %689 = vmatmul.mubr.bf16.vlgmr.msra.gmra.mrb[0].mxu1 %v403_v24  ;;  %v466_v23 = vld [vmem:[#allocation2 + $0x10] sm:$0xff] }
  0xb0   : > { %632 = vmatprep.mubr.bf16.mxu0 %v390_v25  ;;  %696 = vmatprep.mubr.bf16.mxu1 %v406_v26  ;;  %v482_v25 = vld [vmem:[#allocation2 + $0x90] sm:$0xff] }
  0xb7   : > { %633 = vmatmul.mubr.bf16.gmra.mrb[4].mxu0 %v389_v29  ;;  %697 = vmatmul.mubr.bf16.gmra.mrb[4].mxu1 %v405_v30 }
  0xb8   : > { %640 = vmatprep.mubr.bf16.mxu0 %v392_v31  ;;  %704 = vmatprep.mubr.bf16.mxu1 %v408_v32  ;;  %v467_v31 = vld [vmem:[#allocation2 + $0x18] sm:$0xff] }
  0xbf   : > { %641 = vmatmul.mubr.bf16.gmra.mrb[8].mxu0 %v391_v35  ;;  %705 = vmatmul.mubr.bf16.gmra.mrb[8].mxu1 %v407_v36 }
  0xc0   : > { %648 = vmatprep.mubr.bf16.mxu0 %v394_v37  ;;  %712 = vmatprep.mubr.bf16.mxu1 %v410_v38 }
  0xc7   : > { %649 = vmatmul.mubr.bf16.gmra.mrb[12].mxu0 %v393_v41  ;;  %713 = vmatmul.mubr.bf16.gmra.mrb[12].mxu1 %v409_v42 }
  0xc8   : > { %656 = vmatprep.mubr.bf16.mxu0 %v396_v43  ;;  %720 = vmatprep.mubr.bf16.mxu1 %v412_v44  ;;  %v468_v43 = vld [vmem:[#allocation2 + $0x20] sm:$0xff] }
  0xcf   : > { %657 = vmatmul.mubr.bf16.gmra.mrb[16].mxu0 %v395_v47  ;;  %721 = vmatmul.mubr.bf16.gmra.mrb[16].mxu1 %v411_v48 }
  0xd0   : > { %664 = vmatprep.mubr.bf16.mxu0 %v398_v49  ;;  %728 = vmatprep.mubr.bf16.mxu1 %v414_v50 }
  0xd7   : > { %665 = vmatmul.mubr.bf16.gmra.mrb[20].mxu0 %v397_v53  ;;  %729 = vmatmul.mubr.bf16.gmra.mrb[20].mxu1 %v413_v54  ;;  %v485_v53 = vld [vmem:[#allocation2 + $0xa8] sm:$0xff] }
  0xd8   : > { %672 = vmatprep.mubr.bf16.mxu0 %v400_v55  ;;  %736 = vmatprep.mubr.bf16.mxu1 %v416_v56 }
  0xdf   : > { %673 = vmatmul.mubr.bf16.gmra.mrb[24].mxu0 %v399_v59  ;;  %737 = vmatmul.mubr.bf16.gmra.mrb[24].mxu1 %v415_v60 }
  0xe0   : > { %680 = vmatprep.mubr.bf16.mxu0 %v402_v61  ;;  %744 = vmatprep.mubr.bf16.mxu1 %v418_v62 }
  0xe7   : > { %681 = vmatmul.mubr.bf16.gmra.mrb[28].mxu0 %v401_v63  ;;  %745 = vmatmul.mubr.bf16.gmra.mrb[28].mxu1 %v417_v0  ;;  %v470_v63 = vld [vmem:[#allocation2 + $0x30] sm:$0xff] }
 0x182   : > { %v1818_v1 = vpop.f32.mrb[0].mxu0  ;;  %v1866_v2 = vpop.f32.mrb[0].mxu1 }
 0x183   : > { %v1819_v4 = vpop.f32.mrb[1].mxu0  ;;  %v1867_v6 = vpop.f32.mrb[1].mxu1 }
 0x184   : > { %v1820_v7 = vadd.f32 %v1819_v4, %v1818_v1  ;;  %v1868_v8 = vadd.f32 %v1867_v6, %v1866_v2  ;;  %v1821_v9 = vpop.f32.mrb[2].mxu0  ;;  %v1869_v10 = vpop.f32.mrb[2].mxu1  ;;  %v486_v1 = vld [vmem:[#allocation2 + $0xb0] sm:$0xff] }
 0x185   : > { %v1822_v12 = vpop.f32.mrb[3].mxu0  ;;  %v1870_v14 = vpop.f32.mrb[3].mxu1 }
 0x186   : > { %v753_v15 = vadd.f32 %v1820_v7, %v464_v3  ;;  %v769_v16 = vadd.f32 %v1868_v8, %v480_v5  ;;  %v1823_v17 = vadd.f32 %v1822_v12, %v1821_v9  ;;  %v1871_v18 = vadd.f32 %v1870_v14, %v1869_v10  ;;  %v471_v7 = vld [vmem:[#allocation2 + $0x38] sm:$0xff] }
 0x187   : > { %v487_v9 = vld [vmem:[#allocation2 + $0xb8] sm:$0xff] }
 0x188   : > { %785 = vst [vmem:[#allocation2] sm:$0xff] %v753_v15  ;;  %801 = vst [vmem:[#allocation2 + $0x80] sm:$0xff] %v769_v16  ;;  %v754_v19 = vadd.f32 %v1823_v17, %v465_v11  ;;  %v770_v20 = vadd.f32 %v1871_v18, %v481_v13 }
 0x18a   : > { %786 = vst [vmem:[#allocation2 + $0x8] sm:$0xff] %v754_v19  ;;  %802 = vst [vmem:[#allocation2 + $0x88] sm:$0xff] %v770_v20  ;;  %v1824_v21 = vpop.f32.mrb[4].mxu0  ;;  %v1872_v22 = vpop.f32.mrb[4].mxu1  ;;  %v472_v19 = vld [vmem:[#allocation2 + $0x40] sm:$0xff] }
 0x18b   : > { %v1825_v24 = vpop.f32.mrb[5].mxu0  ;;  %v1873_v26 = vpop.f32.mrb[5].mxu1 }
 0x18c   : > { %v1826_v27 = vadd.f32 %v1825_v24, %v1824_v21  ;;  %v1874_v28 = vadd.f32 %v1873_v26, %v1872_v22  ;;  %v1827_v29 = vpop.f32.mrb[6].mxu0  ;;  %v1875_v30 = vpop.f32.mrb[6].mxu1  ;;  %v488_v21 = vld [vmem:[#allocation2 + $0xc0] sm:$0xff] }
 0x18d   : > { %v1828_v32 = vpop.f32.mrb[7].mxu0  ;;  %v1876_v34 = vpop.f32.mrb[7].mxu1 }
 0x18e   : > { %v755_v35 = vadd.f32 %v1826_v27, %v466_v23  ;;  %v771_v36 = vadd.f32 %v1874_v28, %v482_v25  ;;  %v1829_v37 = vadd.f32 %v1828_v32, %v1827_v29  ;;  %v1877_v38 = vadd.f32 %v1876_v34, %v1875_v30  ;;  %v473_v27 = vld [vmem:[#allocation2 + $0x48] sm:$0xff] }
 0x18f   : > { %v489_v29 = vld [vmem:[#allocation2 + $0xc8] sm:$0xff] }
 0x190   : > { %787 = vst [vmem:[#allocation2 + $0x10] sm:$0xff] %v755_v35  ;;  %803 = vst [vmem:[#allocation2 + $0x90] sm:$0xff] %v771_v36  ;;  %v756_v39 = vadd.f32 %v1829_v37, %v467_v31  ;;  %v772_v40 = vadd.f32 %v1877_v38, %v483_v33 }
 0x192   : > { %788 = vst [vmem:[#allocation2 + $0x18] sm:$0xff] %v756_v39  ;;  %804 = vst [vmem:[#allocation2 + $0x98] sm:$0xff] %v772_v40  ;;  %v1830_v41 = vpop.f32.mrb[8].mxu0  ;;  %v1878_v42 = vpop.f32.mrb[8].mxu1  ;;  %v474_v39 = vld [vmem:[#allocation2 + $0x50] sm:$0xff] }
 0x193   : > { %v1831_v44 = vpop.f32.mrb[9].mxu0  ;;  %v1879_v46 = vpop.f32.mrb[9].mxu1 }
 0x194   : > { %v1832_v47 = vadd.f32 %v1831_v44, %v1830_v41  ;;  %v1880_v48 = vadd.f32 %v1879_v46, %v1878_v42  ;;  %v1833_v49 = vpop.f32.mrb[10].mxu0  ;;  %v1881_v50 = vpop.f32.mrb[10].mxu1  ;;  %v490_v41 = vld [vmem:[#allocation2 + $0xd0] sm:$0xff] }
 0x195   : > { %v1834_v52 = vpop.f32.mrb[11].mxu0  ;;  %v1882_v54 = vpop.f32.mrb[11].mxu1 }
 0x196   : > { %v757_v55 = vadd.f32 %v1832_v47, %v468_v43  ;;  %v773_v56 = vadd.f32 %v1880_v48, %v484_v45  ;;  %v1835_v57 = vadd.f32 %v1834_v52, %v1833_v49  ;;  %v1883_v58 = vadd.f32 %v1882_v54, %v1881_v50  ;;  %v475_v47 = vld [vmem:[#allocation2 + $0x58] sm:$0xff] }
 0x197   : > { %v491_v49 = vld [vmem:[#allocation2 + $0xd8] sm:$0xff] }
 0x198   : > { %789 = vst [vmem:[#allocation2 + $0x20] sm:$0xff] %v757_v55  ;;  %805 = vst [vmem:[#allocation2 + $0xa0] sm:$0xff] %v773_v56  ;;  %v758_v59 = vadd.f32 %v1835_v57, %v469_v51  ;;  %v774_v60 = vadd.f32 %v1883_v58, %v485_v53 }
 0x19a   : > { %790 = vst [vmem:[#allocation2 + $0x28] sm:$0xff] %v758_v59  ;;  %806 = vst [vmem:[#allocation2 + $0xa8] sm:$0xff] %v774_v60  ;;  %v1836_v61 = vpop.f32.mrb[12].mxu0  ;;  %v1884_v62 = vpop.f32.mrb[12].mxu1  ;;  %v476_v59 = vld [vmem:[#allocation2 + $0x60] sm:$0xff] }
 0x19b   : > { %v1837_v0 = vpop.f32.mrb[13].mxu0  ;;  %v1885_v2 = vpop.f32.mrb[13].mxu1 }
 0x19c   : > { %v1838_v3 = vadd.f32 %v1837_v0, %v1836_v61  ;;  %v1886_v4 = vadd.f32 %v1885_v2, %v1884_v62  ;;  %v1839_v5 = vpop.f32.mrb[14].mxu0  ;;  %v1887_v6 = vpop.f32.mrb[14].mxu1  ;;  %v492_v61 = vld [vmem:[#allocation2 + $0xe0] sm:$0xff] }
 0x19d   : > { %v1840_v8 = vpop.f32.mrb[15].mxu0  ;;  %v1888_v10 = vpop.f32.mrb[15].mxu1 }
 0x19e   : > { %v759_v11 = vadd.f32 %v1838_v3, %v470_v63  ;;  %v775_v12 = vadd.f32 %v1886_v4, %v486_v1  ;;  %v1841_v13 = vadd.f32 %v1840_v8, %v1839_v5  ;;  %v1889_v14 = vadd.f32 %v1888_v10, %v1887_v6  ;;  %v477_v3 = vld [vmem:[#allocation2 + $0x68] sm:$0xff] }
 0x19f   : > { %v493_v5 = vld [vmem:[#allocation2 + $0xe8] sm:$0xff] }
 0x1a0   : > { %791 = vst [vmem:[#allocation2 + $0x30] sm:$0xff] %v759_v11  ;;  %807 = vst [vmem:[#allocation2 + $0xb0] sm:$0xff] %v775_v12  ;;  %v760_v15 = vadd.f32 %v1841_v13, %v471_v7  ;;  %v776_v16 = vadd.f32 %v1889_v14, %v487_v9 }
 0x1a2   : > { %792 = vst [vmem:[#allocation2 + $0x38] sm:$0xff] %v760_v15  ;;  %808 = vst [vmem:[#allocation2 + $0xb8] sm:$0xff] %v776_v16  ;;  %v1842_v17 = vpop.f32.mrb[16].mxu0  ;;  %v1890_v18 = vpop.f32.mrb[16].mxu1  ;;  %v478_v15 = vld [vmem:[#allocation2 + $0x70] sm:$0xff] }
 0x1a3   : > { %v1843_v20 = vpop.f32.mrb[17].mxu0  ;;  %v1891_v22 = vpop.f32.mrb[17].mxu1 }
 0x1a4   : > { %v1844_v23 = vadd.f32 %v1843_v20, %v1842_v17  ;;  %v1892_v24 = vadd.f32 %v1891_v22, %v1890_v18  ;;  %v1845_v25 = vpop.f32.mrb[18].mxu0  ;;  %v1893_v26 = vpop.f32.mrb[18].mxu1  ;;  %v494_v17 = vld [vmem:[#allocation2 + $0xf0] sm:$0xff] }
 0x1a5   : > { %v1846_v28 = vpop.f32.mrb[19].mxu0  ;;  %v1894_v30 = vpop.f32.mrb[19].mxu1 }
 0x1a6   : > { %v761_v31 = vadd.f32 %v1844_v23, %v472_v19  ;;  %v777_v32 = vadd.f32 %v1892_v24, %v488_v21  ;;  %v1847_v33 = vadd.f32 %v1846_v28, %v1845_v25  ;;  %v1895_v34 = vadd.f32 %v1894_v30, %v1893_v26  ;;  %v479_v23 = vld [vmem:[#allocation2 + $0x78] sm:$0xff] }
 0x1a7   : > { %v495_v25 = vld [vmem:[#allocation2 + $0xf8] sm:$0xff] }
 0x1a8   : > { %793 = vst [vmem:[#allocation2 + $0x40] sm:$0xff] %v761_v31  ;;  %809 = vst [vmem:[#allocation2 + $0xc0] sm:$0xff] %v777_v32  ;;  %v762_v35 = vadd.f32 %v1847_v33, %v473_v27  ;;  %v778_v36 = vadd.f32 %v1895_v34, %v489_v29 }
 0x1aa   : > { %794 = vst [vmem:[#allocation2 + $0x48] sm:$0xff] %v762_v35  ;;  %810 = vst [vmem:[#allocation2 + $0xc8] sm:$0xff] %v778_v36  ;;  %v1848_v37 = vpop.f32.mrb[20].mxu0  ;;  %v1896_v38 = vpop.f32.mrb[20].mxu1 }
 0x1ab   : > { %v1849_v40 = vpop.f32.mrb[21].mxu0  ;;  %v1897_v42 = vpop.f32.mrb[21].mxu1 }
 0x1ac   : > { %v1850_v43 = vadd.f32 %v1849_v40, %v1848_v37  ;;  %v1898_v44 = vadd.f32 %v1897_v42, %v1896_v38  ;;  %v1851_v45 = vpop.f32.mrb[22].mxu0  ;;  %v1899_v46 = vpop.f32.mrb[22].mxu1 }
 0x1ad   : > { %v1852_v48 = vpop.f32.mrb[23].mxu0  ;;  %v1900_v50 = vpop.f32.mrb[23].mxu1 }
 0x1ae   : > { %v763_v51 = vadd.f32 %v1850_v43, %v474_v39  ;;  %v779_v52 = vadd.f32 %v1898_v44, %v490_v41  ;;  %v1853_v53 = vadd.f32 %v1852_v48, %v1851_v45  ;;  %v1901_v54 = vadd.f32 %v1900_v50, %v1899_v46 }
 0x1b0   : > { %795 = vst [vmem:[#allocation2 + $0x50] sm:$0xff] %v763_v51  ;;  %811 = vst [vmem:[#allocation2 + $0xd0] sm:$0xff] %v779_v52  ;;  %v764_v55 = vadd.f32 %v1853_v53, %v475_v47  ;;  %v780_v56 = vadd.f32 %v1901_v54, %v491_v49 }
 0x1b2   : > { %796 = vst [vmem:[#allocation2 + $0x58] sm:$0xff] %v764_v55  ;;  %812 = vst [vmem:[#allocation2 + $0xd8] sm:$0xff] %v780_v56  ;;  %v1854_v57 = vpop.f32.mrb[24].mxu0  ;;  %v1902_v58 = vpop.f32.mrb[24].mxu1 }
 0x1b3   : > { %v1855_v60 = vpop.f32.mrb[25].mxu0  ;;  %v1903_v62 = vpop.f32.mrb[25].mxu1 }
 0x1b4   : > { %v1856_v63 = vadd.f32 %v1855_v60, %v1854_v57  ;;  %v1904_v0 = vadd.f32 %v1903_v62, %v1902_v58  ;;  %v1857_v1 = vpop.f32.mrb[26].mxu0  ;;  %v1905_v2 = vpop.f32.mrb[26].mxu1 }
 0x1b5   : > { %v1858_v4 = vpop.f32.mrb[27].mxu0  ;;  %v1906_v6 = vpop.f32.mrb[27].mxu1 }
 0x1b6   : > { %v765_v7 = vadd.f32 %v1856_v63, %v476_v59  ;;  %v781_v8 = vadd.f32 %v1904_v0, %v492_v61  ;;  %v1859_v9 = vadd.f32 %v1858_v4, %v1857_v1  ;;  %v1907_v10 = vadd.f32 %v1906_v6, %v1905_v2 }
 0x1b8   : > { %797 = vst [vmem:[#allocation2 + $0x60] sm:$0xff] %v765_v7  ;;  %813 = vst [vmem:[#allocation2 + $0xe0] sm:$0xff] %v781_v8  ;;  %v766_v11 = vadd.f32 %v1859_v9, %v477_v3  ;;  %v782_v12 = vadd.f32 %v1907_v10, %v493_v5 }
 0x1ba   : > { %798 = vst [vmem:[#allocation2 + $0x68] sm:$0xff] %v766_v11  ;;  %814 = vst [vmem:[#allocation2 + $0xe8] sm:$0xff] %v782_v12  ;;  %v1860_v13 = vpop.f32.mrb[28].mxu0  ;;  %v1908_v14 = vpop.f32.mrb[28].mxu1 }
 0x1bb   : > { %v1861_v16 = vpop.f32.mrb[29].mxu0  ;;  %v1909_v18 = vpop.f32.mrb[29].mxu1 }
 0x1bc   : > { %v1862_v19 = vadd.f32 %v1861_v16, %v1860_v13  ;;  %v1910_v20 = vadd.f32 %v1909_v18, %v1908_v14  ;;  %v1863_v21 = vpop.f32.mrb[30].mxu0  ;;  %v1911_v22 = vpop.f32.mrb[30].mxu1 }
 0x1bd   : > { %v1864_v24 = vpop.f32.mrb[31].mxu0  ;;  %v1912_v26 = vpop.f32.mrb[31].mxu1 }
 0x1be   : > { %v767_v27 = vadd.f32 %v1862_v19, %v478_v15  ;;  %v783_v28 = vadd.f32 %v1910_v20, %v494_v17  ;;  %v1865_v29 = vadd.f32 %v1864_v24, %v1863_v21  ;;  %v1913_v30 = vadd.f32 %v1912_v26, %v1911_v22 }
 0x1c0   : > { %799 = vst [vmem:[#allocation2 + $0x70] sm:$0xff] %v767_v27  ;;  %815 = vst [vmem:[#allocation2 + $0xf0] sm:$0xff] %v783_v28  ;;  %v768_v31 = vadd.f32 %v1865_v29, %v479_v23  ;;  %v784_v32 = vadd.f32 %v1913_v30, %v495_v25 }
 0x1c2   : > { %800 = vst [vmem:[#allocation2 + $0x78] sm:$0xff] %v768_v31  ;;  %816 = vst [vmem:[#allocation2 + $0xf8] sm:$0xff] %v784_v32 }
 0x1c3 PF: > { %s1777_s12 = sadd.s32 4294967295, %s2634_s27 }
 0x1c4   : > { %p1778_p0 = scmp.ne.s32.totalorder %s2385_s15, %s1777_s12 }
 0x1c5   : > { %v856_v33 = vld [vmem:[%s2641_s24 + $0x10] sm:$0xff] (!%p1778_p0)  ;;  %v854_v34 = vld [vmem:[%s2641_s24] sm:$0xff] (!%p1778_p0)  ;;  %v2410_v35 = vmov (!%p1778_p0), 0   ;;  %v857_v36 = vld [vmem:[%s2641_s24 + $0x18] sm:$0xff] (!%p1778_p0) }
 0x1c6   : > { %821 = sbr.rel (%p1778_p0) target bundleno = 1084 (0x43c), region = 56  ;;  %2206 = vset.pattern.permute.xlu1 (!%p1778_p0), %v2410_v35  ;;  %2205 = vset.pattern.permute.xlu0 (!%p1778_p0), %v2410_v35  ;;  %v855_v37 = vld [vmem:[%s2641_s24 + $0x8] sm:$0xff] (!%p1778_p0)  ;;  %v858_v39 = vld [vmem:[%s2641_s24 + $0x20] sm:$0xff] (!%p1778_p0)  ;;  %v861_v40 = vld [vmem:[%s2641_s24 + $0x38] sm:$0xff] (!%p1778_p0) }
 0x1c7   : > { %898 = vperm.xlu1 (!%p1778_p0), %2206, %v856_v33   ;;  %888 = vperm.xlu0 (!%p1778_p0), %2205, %v854_v34   ;;  %v859_v38 = vld [vmem:[%s2641_s24 + $0x28] sm:$0xff] (!%p1778_p0)  ;;  %v860_v41 = vld [vmem:[%s2641_s24 + $0x30] sm:$0xff] (!%p1778_p0)  ;;  %v2207_v42 = vld [vmem:[%s2886_s5] sm:$0xff] (!%p1778_p0)  }
 0x1c8   : > { %v2208_v43 = vld [vmem:[%s2886_s5 + $0x8] sm:$0xff] (!%p1778_p0)   ;;  %1962 = vmatprep.subr.bf16.mxu0 (!%p1778_p0), %v2207_v42  ;;  %v862_v45 = vld [vmem:[%s2641_s24 + $0x40] sm:$0xff] (!%p1778_p0)  ;;  %v2209_v46 = vld [vmem:[%s2886_s5 + $0x10] sm:$0xff] (!%p1778_p0)  }
 0x1c9   : > { %v863_v44 = vld [vmem:[%s2641_s24 + $0x48] sm:$0xff] (!%p1778_p0)  ;;  %1963 = vmatpush3.bf16.msra.mxu0 (!%p1778_p0), %v2207_v42  ;;  %v865_v47 = vld [vmem:[%s2641_s24 + $0x58] sm:$0xff] (!%p1778_p0)  ;;  %v864_v48 = vld [vmem:[%s2641_s24 + $0x50] sm:$0xff] (!%p1778_p0) }
 0x1ca   : > { %1964 = vmatprep.subr.bf16.mxu0 (!%p1778_p0), %v2208_v43  ;;  %v2210_v49 = vld [vmem:[%s2886_s5 + $0x18] sm:$0xff] (!%p1778_p0)   ;;  %v867_v50 = vld [vmem:[%s2641_s24 + $0x68] sm:$0xff] (!%p1778_p0)  ;;  %v866_v51 = vld [vmem:[%s2641_s24 + $0x60] sm:$0xff] (!%p1778_p0) }
 0x1cb   : > { %903 = vperm.xlu1 (!%p1778_p0), %2206, %v857_v36   ;;  %893 = vperm.xlu0 (!%p1778_p0), %2205, %v855_v37   ;;  %v2211_v52 = vld [vmem:[%s2886_s5 + $0x20] sm:$0xff] (!%p1778_p0)   ;;  %v869_v53 = vld [vmem:[%s2641_s24 + $0x78] sm:$0xff] (!%p1778_p0)  ;;  %v868_v54 = vld [vmem:[%s2641_s24 + $0x70] sm:$0xff] (!%p1778_p0) }
 0x1cc   : > { %v2212_v55 = vld [vmem:[%s2886_s5 + $0x28] sm:$0xff] (!%p1778_p0)   ;;  %v870_v57 = vld [vmem:[%s2641_s24 + $0x80] sm:$0xff] (!%p1778_p0)  ;;  %v2213_v58 = vld [vmem:[%s2886_s5 + $0x30] sm:$0xff] (!%p1778_p0)  }
 0x1cd   : > { %1965 = vmatpush3.bf16.msra.mxu0 %v2208_v43  ;;  %v871_v56 = vld [vmem:[%s2641_s24 + $0x88] sm:$0xff]  ;;  %v873_v59 = vld [vmem:[%s2641_s24 + $0x98] sm:$0xff]  ;;  %v872_v60 = vld [vmem:[%s2641_s24 + $0x90] sm:$0xff] }
 0x1ce   : > { %1966 = vmatprep.subr.bf16.mxu0 %v2209_v46  ;;  %v2214_v61 = vld [vmem:[%s2886_s5 + $0x38] sm:$0xff]   ;;  %v875_v62 = vld [vmem:[%s2641_s24 + $0xa8] sm:$0xff]  ;;  %v874_v63 = vld [vmem:[%s2641_s24 + $0xa0] sm:$0xff] }
 0x1cf   : > { %913 = vperm.xlu1 %2206, %v859_v38   ;;  %908 = vperm.xlu0 %2205, %v858_v39   ;;  %v877_v0 = vld [vmem:[%s2641_s24 + $0xb8] sm:$0xff]  ;;  %v876_v1 = vld [vmem:[%s2641_s24 + $0xb0] sm:$0xff]  ;;  %v879_v2 = vld [vmem:[%s2641_s24 + $0xc8] sm:$0xff] }
 0x1d0   : > { %v878_v3 = vld [vmem:[%s2641_s24 + $0xc0] sm:$0xff]  ;;  %v881_v4 = vld [vmem:[%s2641_s24 + $0xd8] sm:$0xff]  ;;  %v880_v5 = vld [vmem:[%s2641_s24 + $0xd0] sm:$0xff] }
 0x1d1   : > { %1967 = vmatpush3.bf16.msra.mxu0 %v2209_v46  ;;  %v883_v6 = vld [vmem:[%s2641_s24 + $0xe8] sm:$0xff]  ;;  %v882_v7 = vld [vmem:[%s2641_s24 + $0xe0] sm:$0xff]  ;;  %v885_v8 = vld [vmem:[%s2641_s24 + $0xf8] sm:$0xff] }
 0x1d2   : > { %1968 = vmatprep.subr.bf16.mxu0 %v2210_v49  ;;  %v884_v9 = vld [vmem:[%s2641_s24 + $0xf0] sm:$0xff]  ;;  %v2215_v10 = vld [vmem:[%s2887_s6] sm:$0xff]   ;;  %v2216_v11 = vld [vmem:[%s2887_s6 + $0x8] sm:$0xff]  }
 0x1d3   : > { %923 = vperm.xlu1 %2206, %v861_v40   ;;  %918 = vperm.xlu0 %2205, %v860_v41   ;;  %v2217_v12 = vld [vmem:[%s2887_s6 + $0x10] sm:$0xff]   ;;  %v2218_v13 = vld [vmem:[%s2887_s6 + $0x18] sm:$0xff]   ;;  %v2219_v14 = vld [vmem:[%s2887_s6 + $0x20] sm:$0xff]  }
 0x1d4   : > { %2010 = vmatprep.subr.bf16.mxu1 %v2215_v10  ;;  %v2220_v15 = vld [vmem:[%s2887_s6 + $0x28] sm:$0xff]   ;;  %v824_v18 = vld [vmem:[#allocation2 + $0x10] sm:$0xff]  ;;  %v822_v19 = vld [vmem:[#allocation2] sm:$0xff] }
 0x1d5   : > { %1969 = vmatpush3.bf16.msra.mxu0 %v2210_v49  ;;  %2011 = vmatpush3.bf16.msra.mxu1 %v2215_v10  ;;  %v825_v20 = vld [vmem:[#allocation2 + $0x18] sm:$0xff]  ;;  %v823_v21 = vld [vmem:[#allocation2 + $0x8] sm:$0xff]  ;;  %v826_v29 = vld [vmem:[#allocation2 + $0x20] sm:$0xff] }
 0x1d6   : > { %1970 = vmatprep.subr.bf16.mxu0 %v2211_v52  ;;  %2012 = vmatprep.subr.bf16.mxu1 %v2216_v11  ;;  %v827_v28 = vld [vmem:[#allocation2 + $0x28] sm:$0xff]  ;;  %v829_v36 = vld [vmem:[#allocation2 + $0x38] sm:$0xff]  ;;  %v828_v37 = vld [vmem:[#allocation2 + $0x30] sm:$0xff] }
 0x1d7   : > { %933 = vperm.xlu1 %2206, %v863_v44   ;;  %928 = vperm.xlu0 %2205, %v862_v45   ;;  %v831_v43 = vld [vmem:[#allocation2 + $0x48] sm:$0xff]  ;;  %v830_v44 = vld [vmem:[#allocation2 + $0x40] sm:$0xff] }
 0x1d9   : > { %1971 = vmatpush3.bf16.msra.mxu0 %v2211_v52  ;;  %2013 = vmatpush3.bf16.msra.mxu1 %v2216_v11 }
 0x1da   : > { %1972 = vmatprep.subr.bf16.mxu0 %v2212_v55  ;;  %2014 = vmatprep.subr.bf16.mxu1 %v2217_v12 }
 0x1db   : > { %943 = vperm.xlu1 %2206, %v865_v47   ;;  %938 = vperm.xlu0 %2205, %v864_v48  }
 0x1dd   : > { %1973 = vmatpush3.bf16.msra.mxu0 %v2212_v55  ;;  %2015 = vmatpush3.bf16.msra.mxu1 %v2217_v12 }
 0x1de   : > { %1974 = vmatprep.subr.bf16.mxu0 %v2213_v58  ;;  %2016 = vmatprep.subr.bf16.mxu1 %v2218_v13 }
 0x1df   : > { %953 = vperm.xlu1 %2206, %v867_v50   ;;  %948 = vperm.xlu0 %2205, %v866_v51   ;;  %v833_v50 = vld [vmem:[#allocation2 + $0x58] sm:$0xff]  ;;  %v832_v51 = vld [vmem:[#allocation2 + $0x50] sm:$0xff] }
 0x1e1   : > { %1975 = vmatpush3.bf16.msra.mxu0 %v2213_v58  ;;  %2017 = vmatpush3.bf16.msra.mxu1 %v2218_v13  ;;  %v834_v58 = vld [vmem:[#allocation2 + $0x60] sm:$0xff] }
 0x1e2   : > { %1976 = vmatprep.subr.bf16.mxu0 %v2214_v61  ;;  %2018 = vmatprep.subr.bf16.mxu1 %v2219_v14 }
 0x1e3   : > { %963 = vperm.xlu1 %2206, %v869_v53   ;;  %958 = vperm.xlu0 %2205, %v868_v54  }
 0x1e5   : > { %1977 = vmatpush3.bf16.msra.mxu0 %v2214_v61  ;;  %2019 = vmatpush3.bf16.msra.mxu1 %v2219_v14  ;;  %v841_v14 = vld [vmem:[#allocation2 + $0x98] sm:$0xff] }
 0x1e6   : > { %2020 = vmatprep.subr.bf16.mxu1 %v2220_v15 }
 0x1e7   : > { %973 = vperm.xlu1 %2206, %v871_v56   ;;  %968 = vperm.xlu0 %2205, %v870_v57   ;;  %v835_v57 = vld [vmem:[#allocation2 + $0x68] sm:$0xff] }
 0x1e9   : > { %2021 = vmatpush3.bf16.msra.mxu1 %v2220_v15  ;;  %v840_v15 = vld [vmem:[#allocation2 + $0x90] sm:$0xff] }
 0x1eb   : > { %983 = vperm.xlu1 %2206, %v873_v59   ;;  %978 = vperm.xlu0 %2205, %v872_v60  }
 0x1ef   : > { %993 = vperm.xlu1 %2206, %v875_v62   ;;  %988 = vperm.xlu0 %2205, %v874_v63  }
 0x1f3   : > { %1003 = vperm.xlu1 %2206, %v877_v0   ;;  %998 = vperm.xlu0 %2205, %v876_v1   ;;  %v837_v0 = vld [vmem:[#allocation2 + $0x78] sm:$0xff]  ;;  %v836_v1 = vld [vmem:[#allocation2 + $0x70] sm:$0xff] }
 0x1f7   : > { %1013 = vperm.xlu1 %2206, %v879_v2   ;;  %1008 = vperm.xlu0 %2205, %v878_v3  }
 0x1fb   : > { %1023 = vperm.xlu1 %2206, %v881_v4   ;;  %1018 = vperm.xlu0 %2205, %v880_v5  }
 0x1ff   : > { %1033 = vperm.xlu1 %2206, %v883_v6   ;;  %1028 = vperm.xlu0 %2205, %v882_v7   ;;  %v839_v7 = vld [vmem:[#allocation2 + $0x88] sm:$0xff] }
 0x203   : > { %1043 = vperm.xlu1 %2206, %v885_v8   ;;  %1038 = vperm.xlu0 %2205, %v884_v9   ;;  %v838_v8 = vld [vmem:[#allocation2 + $0x80] sm:$0xff] }
 0x246   : > { %v899_v16 = vpop.permute.xlu1 %898  ;;  %v889_v17 = vpop.permute.xlu0 %888 }
 0x247   : > { %v1048_v24 = vmul.f32 %v899_v16, %v824_v18  ;;  %v1046_v25 = vmul.f32 %v889_v17, %v822_v19 }
 0x24a   : > { %v904_v22 = vpop.permute.xlu1 %903  ;;  %v894_v23 = vpop.permute.xlu0 %893 }
 0x24b   : > { %v1049_v26 = vmul.f32 %v904_v22, %v825_v20  ;;  %v1047_v27 = vmul.f32 %v894_v23, %v823_v21  ;;  %v843_v21 = vld [vmem:[#allocation2 + $0xa8] sm:$0xff]  ;;  %v842_v22 = vld [vmem:[#allocation2 + $0xa0] sm:$0xff] }
 0x24d   : > { %v1079_v30 = vpack.c.bf16 %v1049_v26, %v1048_v24  ;;  %v1078_v31 = vpack.c.bf16 %v1047_v27, %v1046_v25 }
 0x24e   : > { %v914_v32 = vpop.permute.xlu1 %913  ;;  %v909_v33 = vpop.permute.xlu0 %908 }
 0x24f   : > { %v1051_v34 = vmul.f32 %v914_v32, %v827_v28  ;;  %v1050_v35 = vmul.f32 %v909_v33, %v826_v29  ;;  %1978 = vmatprep.mubr.bf16.mxu0 %v1078_v31  ;;  %v845_v28 = vld [vmem:[#allocation2 + $0xb8] sm:$0xff]  ;;  %v844_v29 = vld [vmem:[#allocation2 + $0xb0] sm:$0xff] }
 0x250   : > { %1979 = vmatmul.mubr.bf16.vlgmr.msra.gmra.mrb[0].mxu0 %v1079_v30 }
 0x251   : > { %v1080_v38 = vpack.c.bf16 %v1051_v34, %v1050_v35  ;;  %v847_v35 = vld [vmem:[#allocation2 + $0xc8] sm:$0xff] }
 0x252   : > { %v924_v39 = vpop.permute.xlu1 %923  ;;  %v919_v40 = vpop.permute.xlu0 %918 }
 0x253   : > { %v1053_v41 = vmul.f32 %v924_v39, %v829_v36  ;;  %v1052_v42 = vmul.f32 %v919_v40, %v828_v37  ;;  %1982 = vmatprep.mubr.bf16.mxu0 %v1080_v38  ;;  %v846_v36 = vld [vmem:[#allocation2 + $0xc0] sm:$0xff] }
 0x255   : > { %v1081_v45 = vpack.c.bf16 %v1053_v41, %v1052_v42  ;;  %v849_v42 = vld [vmem:[#allocation2 + $0xd8] sm:$0xff] }
 0x256   : > { %v934_v46 = vpop.permute.xlu1 %933  ;;  %v929_v47 = vpop.permute.xlu0 %928 }
 0x257   : > { %v1055_v48 = vmul.f32 %v934_v46, %v831_v43  ;;  %v1054_v49 = vmul.f32 %v929_v47, %v830_v44  ;;  %v848_v43 = vld [vmem:[#allocation2 + $0xd0] sm:$0xff] }
 0x258   : > { %1983 = vmatmul.mubr.bf16.gmra.mrb[4].mxu0 %v1081_v45 }
 0x259   : > { %v1082_v52 = vpack.c.bf16 %v1055_v48, %v1054_v49  ;;  %v851_v49 = vld [vmem:[#allocation2 + $0xe8] sm:$0xff] }
 0x25a   : > { %v944_v53 = vpop.permute.xlu1 %943  ;;  %v939_v54 = vpop.permute.xlu0 %938 }
 0x25b   : > { %v1057_v55 = vmul.f32 %v944_v53, %v833_v50  ;;  %v1056_v56 = vmul.f32 %v939_v54, %v832_v51  ;;  %1986 = vmatprep.mubr.bf16.mxu0 %v1082_v52  ;;  %v850_v50 = vld [vmem:[#allocation2 + $0xe0] sm:$0xff] }
 0x25d   : > { %v1083_v59 = vpack.c.bf16 %v1057_v55, %v1056_v56  ;;  %v853_v56 = vld [vmem:[#allocation2 + $0xf8] sm:$0xff] }
 0x25e   : > { %v954_v60 = vpop.permute.xlu1 %953  ;;  %v949_v61 = vpop.permute.xlu0 %948 }
 0x25f   : > { %v1059_v62 = vmul.f32 %v954_v60, %v835_v57  ;;  %v1058_v63 = vmul.f32 %v949_v61, %v834_v58  ;;  %v852_v57 = vld [vmem:[#allocation2 + $0xf0] sm:$0xff] }
 0x260   : > { %1987 = vmatmul.mubr.bf16.gmra.mrb[8].mxu0 %v1083_v59 }
 0x261   : > { %v1084_v2 = vpack.c.bf16 %v1059_v62, %v1058_v63 }
 0x262   : > { %v964_v3 = vpop.permute.xlu1 %963  ;;  %v959_v4 = vpop.permute.xlu0 %958 }
 0x263   : > { %v1061_v5 = vmul.f32 %v964_v3, %v837_v0  ;;  %v1060_v6 = vmul.f32 %v959_v4, %v836_v1  ;;  %1990 = vmatprep.mubr.bf16.mxu0 %v1084_v2  ;;  %v2221_v0 = vld [vmem:[%s2887_s6 + $0x30] sm:$0xff]   ;;  %v2222_v1 = vld [vmem:[%s2887_s6 + $0x38] sm:$0xff]  }
 0x264   : > { %2022 = vmatprep.subr.bf16.mxu1 %v2221_v0 }
 0x265   : > { %v1085_v9 = vpack.c.bf16 %v1061_v5, %v1060_v6  ;;  %2023 = vmatpush3.bf16.msra.mxu1 %v2221_v0 }
 0x266   : > { %v974_v10 = vpop.permute.xlu1 %973  ;;  %v969_v11 = vpop.permute.xlu0 %968  ;;  %2024 = vmatprep.subr.bf16.mxu1 %v2222_v1 }
 0x267   : > { %v1063_v12 = vmul.f32 %v974_v10, %v839_v7  ;;  %v1062_v13 = vmul.f32 %v969_v11, %v838_v8 }
 0x268   : > { %1991 = vmatmul.mubr.bf16.gmra.mrb[12].mxu0 %v1085_v9 }
 0x269   : > { %v1086_v16 = vpack.c.bf16 %v1063_v12, %v1062_v13  ;;  %2025 = vmatpush3.bf16.msra.mxu1 %v2222_v1 }
 0x26a   : > { %v984_v17 = vpop.permute.xlu1 %983  ;;  %v979_v18 = vpop.permute.xlu0 %978 }
 0x26b   : > { %v1065_v19 = vmul.f32 %v984_v17, %v841_v14  ;;  %v1064_v20 = vmul.f32 %v979_v18, %v840_v15  ;;  %1994 = vmatprep.mubr.bf16.mxu0 %v1086_v16 }
 0x26d   : > { %v1087_v23 = vpack.c.bf16 %v1065_v19, %v1064_v20 }
 0x26e   : > { %v994_v24 = vpop.permute.xlu1 %993  ;;  %v989_v25 = vpop.permute.xlu0 %988 }
 0x26f   : > { %v1067_v26 = vmul.f32 %v994_v24, %v843_v21  ;;  %v1066_v27 = vmul.f32 %v989_v25, %v842_v22 }
 0x270   : > { %1995 = vmatmul.mubr.bf16.gmra.mrb[16].mxu0 %v1087_v23 }
 0x271   : > { %v1088_v30 = vpack.c.bf16 %v1067_v26, %v1066_v27 }
 0x272   : > { %v1004_v31 = vpop.permute.xlu1 %1003  ;;  %v999_v32 = vpop.permute.xlu0 %998 }
 0x273   : > { %v1069_v33 = vmul.f32 %v1004_v31, %v845_v28  ;;  %v1068_v34 = vmul.f32 %v999_v32, %v844_v29  ;;  %1998 = vmatprep.mubr.bf16.mxu0 %v1088_v30 }
 0x275   : > { %v1089_v37 = vpack.c.bf16 %v1069_v33, %v1068_v34 }
 0x276   : > { %v1014_v38 = vpop.permute.xlu1 %1013  ;;  %v1009_v39 = vpop.permute.xlu0 %1008 }
 0x277   : > { %v1071_v40 = vmul.f32 %v1014_v38, %v847_v35  ;;  %v1070_v41 = vmul.f32 %v1009_v39, %v846_v36 }
 0x278   : > { %1999 = vmatmul.mubr.bf16.gmra.mrb[20].mxu0 %v1089_v37 }
 0x279   : > { %v1090_v44 = vpack.c.bf16 %v1071_v40, %v1070_v41 }
 0x27a   : > { %v1024_v45 = vpop.permute.xlu1 %1023  ;;  %v1019_v46 = vpop.permute.xlu0 %1018 }
 0x27b   : > { %v1073_v47 = vmul.f32 %v1024_v45, %v849_v42  ;;  %v1072_v48 = vmul.f32 %v1019_v46, %v848_v43  ;;  %2002 = vmatprep.mubr.bf16.mxu0 %v1090_v44 }
 0x27d   : > { %v1091_v51 = vpack.c.bf16 %v1073_v47, %v1072_v48 }
 0x27e   : > { %v1034_v52 = vpop.permute.xlu1 %1033  ;;  %v1029_v53 = vpop.permute.xlu0 %1028 }
 0x27f   : > { %v1075_v54 = vmul.f32 %v1034_v52, %v851_v49  ;;  %v1074_v55 = vmul.f32 %v1029_v53, %v850_v50 }
 0x280   : > { %2003 = vmatmul.mubr.bf16.gmra.mrb[24].mxu0 %v1091_v51 }
 0x281   : > { %v1092_v58 = vpack.c.bf16 %v1075_v54, %v1074_v55 }
 0x282   : > { %v1044_v59 = vpop.permute.xlu1 %1043  ;;  %v1039_v60 = vpop.permute.xlu0 %1038 }
 0x283   : > { %v1077_v61 = vmul.f32 %v1044_v59, %v853_v56  ;;  %v1076_v62 = vmul.f32 %v1039_v60, %v852_v57  ;;  %2006 = vmatprep.mubr.bf16.mxu0 %v1092_v58 }
 0x285   : > { %v1093_v63 = vpack.c.bf16 %v1077_v61, %v1076_v62 }
 0x288   : > { %2007 = vmatmul.mubr.bf16.gmra.mrb[28].mxu0 %v1093_v63 }
 0x323   : > { %v1980_v2 = vpop.f32.mrb[0].mxu0 }
 0x324   : > { %v1192_v3 = vpop.f32.mrb[1].mxu0  ;;  %v1321_v5 = vmax.f32 %v1980_v2, 0.0 }
 0x325   : > { %v1981_v4 = vpop.f32.mrb[2].mxu0  ;;  %v1319_v8 = vmax.f32 %v1192_v3, 0.0 }
 0x326   : > { %v1322_v6 = vmax.f32 %v1981_v4, 0.0  ;;  %v1195_v7 = vpop.f32.mrb[3].mxu0 }
 0x327   : > { %v1320_v9 = vmax.f32 %v1195_v7, 0.0 }
 0x328   : > { %v1352_v10 = vpack.c.bf16 %v1322_v6, %v1321_v5 }
 0x329   : > { %v1351_v11 = vpack.c.bf16 %v1320_v9, %v1319_v8 }
 0x32b   : > { %v1984_v12 = vpop.f32.mrb[4].mxu0  ;;  %2026 = vmatprep.mubr.bf16.mxu1 %v1351_v11 }
 0x32c   : > { %v1208_v13 = vpop.f32.mrb[5].mxu0  ;;  %2027 = vmatmul.mubr.bf16.vlgmr.msra.gmra.mrb[0].mxu1 %v1352_v10  ;;  %v1325_v15 = vmax.f32 %v1984_v12, 0.0 }
 0x32d   : > { %v1985_v14 = vpop.f32.mrb[6].mxu0  ;;  %v1323_v18 = vmax.f32 %v1208_v13, 0.0 }
 0x32e   : > { %v1326_v16 = vmax.f32 %v1985_v14, 0.0  ;;  %v1211_v17 = vpop.f32.mrb[7].mxu0 }
 0x32f   : > { %v1324_v19 = vmax.f32 %v1211_v17, 0.0 }
 0x330   : > { %v1354_v20 = vpack.c.bf16 %v1326_v16, %v1325_v15 }
 0x331   : > { %v1353_v21 = vpack.c.bf16 %v1324_v19, %v1323_v18 }
 0x333   : > { %v1988_v22 = vpop.f32.mrb[8].mxu0  ;;  %2030 = vmatprep.mubr.bf16.mxu1 %v1353_v21 }
 0x334   : > { %v1224_v23 = vpop.f32.mrb[9].mxu0  ;;  %2031 = vmatmul.mubr.bf16.gmra.mrb[4].mxu1 %v1354_v20  ;;  %v1329_v25 = vmax.f32 %v1988_v22, 0.0 }
 0x335   : > { %v1989_v24 = vpop.f32.mrb[10].mxu0  ;;  %v1327_v28 = vmax.f32 %v1224_v23, 0.0 }
 0x336   : > { %v1330_v26 = vmax.f32 %v1989_v24, 0.0  ;;  %v1227_v27 = vpop.f32.mrb[11].mxu0 }
 0x337   : > { %v1328_v29 = vmax.f32 %v1227_v27, 0.0 }
 0x338   : > { %v1356_v30 = vpack.c.bf16 %v1330_v26, %v1329_v25 }
 0x339   : > { %v1355_v31 = vpack.c.bf16 %v1328_v29, %v1327_v28 }
 0x33b   : > { %v1992_v32 = vpop.f32.mrb[12].mxu0  ;;  %2034 = vmatprep.mubr.bf16.mxu1 %v1355_v31 }
 0x33c   : > { %v1240_v33 = vpop.f32.mrb[13].mxu0  ;;  %2035 = vmatmul.mubr.bf16.gmra.mrb[8].mxu1 %v1356_v30  ;;  %v1333_v35 = vmax.f32 %v1992_v32, 0.0 }
 0x33d   : > { %v1993_v34 = vpop.f32.mrb[14].mxu0  ;;  %v1331_v38 = vmax.f32 %v1240_v33, 0.0 }
 0x33e   : > { %v1334_v36 = vmax.f32 %v1993_v34, 0.0  ;;  %v1243_v37 = vpop.f32.mrb[15].mxu0 }
 0x33f   : > { %v1332_v39 = vmax.f32 %v1243_v37, 0.0 }
 0x340   : > { %v1358_v40 = vpack.c.bf16 %v1334_v36, %v1333_v35 }
 0x341   : > { %v1357_v41 = vpack.c.bf16 %v1332_v39, %v1331_v38 }
 0x343   : > { %v1996_v42 = vpop.f32.mrb[16].mxu0  ;;  %2038 = vmatprep.mubr.bf16.mxu1 %v1357_v41 }
 0x344   : > { %v1256_v43 = vpop.f32.mrb[17].mxu0  ;;  %2039 = vmatmul.mubr.bf16.gmra.mrb[12].mxu1 %v1358_v40  ;;  %v1337_v45 = vmax.f32 %v1996_v42, 0.0 }
 0x345   : > { %v1997_v44 = vpop.f32.mrb[18].mxu0  ;;  %v1335_v48 = vmax.f32 %v1256_v43, 0.0 }
 0x346   : > { %v1338_v46 = vmax.f32 %v1997_v44, 0.0  ;;  %v1259_v47 = vpop.f32.mrb[19].mxu0 }
 0x347   : > { %v1336_v49 = vmax.f32 %v1259_v47, 0.0 }
 0x348   : > { %v1360_v50 = vpack.c.bf16 %v1338_v46, %v1337_v45 }
 0x349   : > { %v1359_v51 = vpack.c.bf16 %v1336_v49, %v1335_v48 }
 0x34b   : > { %v2000_v52 = vpop.f32.mrb[20].mxu0  ;;  %2042 = vmatprep.mubr.bf16.mxu1 %v1359_v51 }
 0x34c   : > { %v1272_v53 = vpop.f32.mrb[21].mxu0  ;;  %2043 = vmatmul.mubr.bf16.gmra.mrb[16].mxu1 %v1360_v50  ;;  %v1341_v55 = vmax.f32 %v2000_v52, 0.0 }
 0x34d   : > { %v2001_v54 = vpop.f32.mrb[22].mxu0  ;;  %v1339_v58 = vmax.f32 %v1272_v53, 0.0 }
 0x34e   : > { %v1342_v56 = vmax.f32 %v2001_v54, 0.0  ;;  %v1275_v57 = vpop.f32.mrb[23].mxu0 }
 0x34f   : > { %v1340_v59 = vmax.f32 %v1275_v57, 0.0 }
 0x350   : > { %v1362_v60 = vpack.c.bf16 %v1342_v56, %v1341_v55 }
 0x351   : > { %v1361_v61 = vpack.c.bf16 %v1340_v59, %v1339_v58 }
 0x353   : > { %v2004_v62 = vpop.f32.mrb[24].mxu0  ;;  %2046 = vmatprep.mubr.bf16.mxu1 %v1361_v61 }
 0x354   : > { %v1288_v63 = vpop.f32.mrb[25].mxu0  ;;  %2047 = vmatmul.mubr.bf16.gmra.mrb[20].mxu1 %v1362_v60  ;;  %v1345_v1 = vmax.f32 %v2004_v62, 0.0 }
 0x355   : > { %v2005_v0 = vpop.f32.mrb[26].mxu0  ;;  %v1343_v4 = vmax.f32 %v1288_v63, 0.0 }
 0x356   : > { %v1346_v2 = vmax.f32 %v2005_v0, 0.0  ;;  %v1291_v3 = vpop.f32.mrb[27].mxu0 }
 0x357   : > { %v1344_v5 = vmax.f32 %v1291_v3, 0.0 }
 0x358   : > { %v1364_v6 = vpack.c.bf16 %v1346_v2, %v1345_v1 }
 0x359   : > { %v1363_v7 = vpack.c.bf16 %v1344_v5, %v1343_v4 }
 0x35b   : > { %v2008_v8 = vpop.f32.mrb[28].mxu0  ;;  %2050 = vmatprep.mubr.bf16.mxu1 %v1363_v7 }
 0x35c   : > { %v1304_v9 = vpop.f32.mrb[29].mxu0  ;;  %2051 = vmatmul.mubr.bf16.gmra.mrb[24].mxu1 %v1364_v6  ;;  %v1349_v11 = vmax.f32 %v2008_v8, 0.0 }
 0x35d   : > { %v2009_v10 = vpop.f32.mrb[30].mxu0  ;;  %v1347_v14 = vmax.f32 %v1304_v9, 0.0 }
 0x35e   : > { %v1350_v12 = vmax.f32 %v2009_v10, 0.0  ;;  %v1307_v13 = vpop.f32.mrb[31].mxu0 }
 0x35f   : > { %v1348_v15 = vmax.f32 %v1307_v13, 0.0 }
 0x360   : > { %v1366_v16 = vpack.c.bf16 %v1350_v12, %v1349_v11 }
 0x361   : > { %v1365_v17 = vpack.c.bf16 %v1348_v15, %v1347_v14 }
 0x363   : > { %2054 = vmatprep.mubr.bf16.mxu1 %v1365_v17 }
 0x364   : > { %2055 = vmatmul.mubr.bf16.gmra.mrb[28].mxu1 %v1366_v16 }
 0x3ff   : > { %v2028_v18 = vpop.f32.mrb[0].mxu1 }
 0x400   : > { %1594 = vst [vmem:[%s2643_s30 + $0x10] sm:$0xff] %v2028_v18  ;;  %v1465_v19 = vpop.f32.mrb[1].mxu1 }
 0x401   : > { %1592 = vst [vmem:[%s2643_s30] sm:$0xff] %v1465_v19  ;;  %v2029_v20 = vpop.f32.mrb[2].mxu1 }
 0x402   : > { %1595 = vst [vmem:[%s2643_s30 + $0x18] sm:$0xff] %v2029_v20  ;;  %v1468_v21 = vpop.f32.mrb[3].mxu1 }
 0x403   : > { %1593 = vst [vmem:[%s2643_s30 + $0x8] sm:$0xff] %v1468_v21 }
 0x407   : > { %v2032_v22 = vpop.f32.mrb[4].mxu1 }
 0x408   : > { %1598 = vst [vmem:[%s2643_s30 + $0x30] sm:$0xff] %v2032_v22  ;;  %v1481_v23 = vpop.f32.mrb[5].mxu1 }
 0x409   : > { %1596 = vst [vmem:[%s2643_s30 + $0x20] sm:$0xff] %v1481_v23  ;;  %v2033_v24 = vpop.f32.mrb[6].mxu1 }
 0x40a   : > { %1599 = vst [vmem:[%s2643_s30 + $0x38] sm:$0xff] %v2033_v24  ;;  %v1484_v25 = vpop.f32.mrb[7].mxu1 }
 0x40b   : > { %1597 = vst [vmem:[%s2643_s30 + $0x28] sm:$0xff] %v1484_v25 }
 0x40f   : > { %v2036_v26 = vpop.f32.mrb[8].mxu1 }
 0x410   : > { %1602 = vst [vmem:[%s2643_s30 + $0x50] sm:$0xff] %v2036_v26  ;;  %v1497_v27 = vpop.f32.mrb[9].mxu1 }
 0x411   : > { %1600 = vst [vmem:[%s2643_s30 + $0x40] sm:$0xff] %v1497_v27  ;;  %v2037_v28 = vpop.f32.mrb[10].mxu1 }
 0x412   : > { %1603 = vst [vmem:[%s2643_s30 + $0x58] sm:$0xff] %v2037_v28  ;;  %v1500_v29 = vpop.f32.mrb[11].mxu1 }
 0x413   : > { %1601 = vst [vmem:[%s2643_s30 + $0x48] sm:$0xff] %v1500_v29 }
 0x417   : > { %v2040_v30 = vpop.f32.mrb[12].mxu1 }
 0x418   : > { %1606 = vst [vmem:[%s2643_s30 + $0x70] sm:$0xff] %v2040_v30  ;;  %v1513_v31 = vpop.f32.mrb[13].mxu1 }
 0x419   : > { %1604 = vst [vmem:[%s2643_s30 + $0x60] sm:$0xff] %v1513_v31  ;;  %v2041_v32 = vpop.f32.mrb[14].mxu1 }
 0x41a   : > { %1607 = vst [vmem:[%s2643_s30 + $0x78] sm:$0xff] %v2041_v32  ;;  %v1516_v33 = vpop.f32.mrb[15].mxu1 }
 0x41b   : > { %1605 = vst [vmem:[%s2643_s30 + $0x68] sm:$0xff] %v1516_v33 }
 0x41f   : > { %v2044_v34 = vpop.f32.mrb[16].mxu1 }
 0x420   : > { %1610 = vst [vmem:[%s2643_s30 + $0x90] sm:$0xff] %v2044_v34  ;;  %v1529_v35 = vpop.f32.mrb[17].mxu1 }
 0x421   : > { %1608 = vst [vmem:[%s2643_s30 + $0x80] sm:$0xff] %v1529_v35  ;;  %v2045_v36 = vpop.f32.mrb[18].mxu1 }
 0x422   : > { %1611 = vst [vmem:[%s2643_s30 + $0x98] sm:$0xff] %v2045_v36  ;;  %v1532_v37 = vpop.f32.mrb[19].mxu1 }
 0x423   : > { %1609 = vst [vmem:[%s2643_s30 + $0x88] sm:$0xff] %v1532_v37 }
 0x427   : > { %v2048_v38 = vpop.f32.mrb[20].mxu1 }
 0x428   : > { %1614 = vst [vmem:[%s2643_s30 + $0xb0] sm:$0xff] %v2048_v38  ;;  %v1545_v39 = vpop.f32.mrb[21].mxu1 }
 0x429   : > { %1612 = vst [vmem:[%s2643_s30 + $0xa0] sm:$0xff] %v1545_v39  ;;  %v2049_v40 = vpop.f32.mrb[22].mxu1 }
 0x42a   : > { %1615 = vst [vmem:[%s2643_s30 + $0xb8] sm:$0xff] %v2049_v40  ;;  %v1548_v41 = vpop.f32.mrb[23].mxu1 }
 0x42b   : > { %1613 = vst [vmem:[%s2643_s30 + $0xa8] sm:$0xff] %v1548_v41 }
 0x42f   : > { %v2052_v42 = vpop.f32.mrb[24].mxu1 }
 0x430   : > { %1618 = vst [vmem:[%s2643_s30 + $0xd0] sm:$0xff] %v2052_v42  ;;  %v1561_v43 = vpop.f32.mrb[25].mxu1 }
 0x431   : > { %1616 = vst [vmem:[%s2643_s30 + $0xc0] sm:$0xff] %v1561_v43  ;;  %v2053_v44 = vpop.f32.mrb[26].mxu1 }
 0x432   : > { %1619 = vst [vmem:[%s2643_s30 + $0xd8] sm:$0xff] %v2053_v44  ;;  %v1564_v45 = vpop.f32.mrb[27].mxu1 }
 0x433   : > { %1617 = vst [vmem:[%s2643_s30 + $0xc8] sm:$0xff] %v1564_v45 }
 0x437   : > { %v2056_v46 = vpop.f32.mrb[28].mxu1 }
 0x438   : > { %1622 = vst [vmem:[%s2643_s30 + $0xf0] sm:$0xff] %v2056_v46  ;;  %v1577_v47 = vpop.f32.mrb[29].mxu1 }
 0x439   : > { %1620 = vst [vmem:[%s2643_s30 + $0xe0] sm:$0xff] %v1577_v47  ;;  %v2057_v48 = vpop.f32.mrb[30].mxu1 }
 0x43a   : > { %1623 = vst [vmem:[%s2643_s30 + $0xf8] sm:$0xff] %v2057_v48  ;;  %v1580_v49 = vpop.f32.mrb[31].mxu1 }
 0x43b   : > { %1621 = vst [vmem:[%s2643_s30 + $0xe8] sm:$0xff] %v1580_v49 }
 0x43c PF: > { %s1801_s27 = sshll.u32 %s2389_s16, 12  ;;  %s1638_s28 = sshll.u32 %s2643_s30, 4  ;;  %s2817_s28 = int_to_ptr.vmem [resolvable:$true] %s1638_s28 }
 0x43d   : > { %s2814_s22 = scalar_lea.hbm %s2888_s7, %s1801_s27  ;;  %s2821_s21 = scalar_lea.sflag [#allocation8], %s309_s25 }
 0x43e   : > { %s2277_s24 = scalar_lea.vmem %s2817_s28, 4096  ;;  %p2912_p8 = scmp.ne.s32.totalorder %s2905_s8, 0 }
 0x43f   : > { %p2278_p5 = scmp.ne.s32.totalorder %s2817_s28, %s2277_s24  ;;  %s2411_s16 = smov [#allocation9]  }
 0x440   : > { %s2281_s11 = sshll.u32 %s2411_s16, 4  ;;  %s2282_s11 = int_to_ptr.vmem [resolvable:$false] %s2281_s11 }
 0x441   : > { %p2279_p2 = pnand %p2278_p5, %p2912_p8  ;;  %s2283_s14 = scalar_lea.vmem %s2282_s11, 8192 }
 0x442   : > { %p2284_p3 = scmp.lt.s32.totalorder %s2817_s28, %s2282_s11  ;;  %p2285_p7 = scmp.lt.s32.totalorder %s2283_s14, %s2277_s24 }
 0x443   : > { %p2280_p12 = pneg %p2279_p2 }
 0x444   : > { %p2286_p9 = por %p2285_p7, %p2284_p3 }
 0x446   : > { %p2287_p11 = pnand %p2286_p9, %p2280_p12 }
 0x448   : > { %2290 = shalt.err (!%p2287_p11)
}
 0x449   : > { %s2291_s25 = scalar_lea.hbm %s2814_s22, 4096  ;;  %s2295_s9 = scalar_lea.hbm %s2888_s7, 16384 }
 0x44a   : > { %p2292_p13 = scmp.ne.s32.totalorder %s2814_s22, %s2291_s25  ;;  %p2296_p10 = scmp.lt.u32.totalorder %s2814_s22, %s2888_s7 }
 0x44b   : > { %p2297_p1 = scmp.lt.u32.totalorder %s2295_s9, %s2291_s25  ;;  %p2299_p5 = scmp.lt.u32.totalorder %s2291_s25, %s2814_s22 }
 0x44c   : > { %p2293_p4 = pnand %p2292_p13, %p2912_p8 }
 0x44d   : > { %p2298_p0 = por %p2297_p1, %p2296_p10 }
 0x44e   : > { %p2294_p6 = pneg %p2293_p4 }
 0x44f   : > { %p2300_p2 = por %p2299_p5, %p2298_p0 }
 0x451   : > { %p2301_p12 = pnand %p2300_p2, %p2294_p6 }
 0x453   : > { %2304 = shalt.err (!%p2301_p12)
}
 0x454   : > { %s2412_s29 = smov 128   ;;  %s2413_s12 = smov 8  }
 0x455   : > { %2078 = dma.vmem_to_hbm [thread:$0]  (%p2912_p8), %s2817_s28, 4096, %s2814_s22, %s2821_s21, %s2412_s29, %s2412_s29, %s2413_s12  }
 0x456 PF: > { %s2913_s15 = sld [smem:[#allocation21_spill]]  ;;  %p2091_p3 = scmp.ge.s32.totalorder %s2401_s19, 2 }
 0x457   : > { %s1653_s27 = sand.u32 1, %s2361_s1  }
 0x458   : > { %s1654_s0 = scalar_lea.sflag [#allocation8], %s1653_s27 }
 0x45c   : > { %p2914_p7 = scmp.ne.s32.totalorder %s2913_s15, 0 }
 0x45e   : > { %p2087_p9 = pnand %p2091_p3, %p2914_p7 }
 0x460   : > { %2356 = dma.done.wait (!%p2087_p9), %s1654_s0, 4096  }
 0x461   : > { %2358 = vsyncadd (!%p2087_p9), %s1654_s0, 4294963200  ;;  %s33_s19 = sadd.s32 1, %s2401_s19   ;;  %s2915_s23 = sld [smem:[#allocation15_spill]] }
 0x462   : > { %p30_p11 = scmp.ge.s32.totalorder %s33_s19, 10   ;;  %s2916_s11 = sld [smem:[#allocation20_spill]] }
 0x463   : > { %s2917_s8 = sld [smem:[#allocation16_spill]]  ;;  %s2918_s14 = sld [smem:[#allocation22_spill]] }
 0x464   : > { %s2919_s15 = sld [smem:[#allocation17_spill]]  ;;  %s2920_s17 = sld [smem:[#allocation18_spill]] }
 0x465   : > { %s2921_s22 = sld [smem:[#allocation19_spill]]  ;;  %s2922_s1 = smov %s2365_s10 }
 0x466   : > { %s2924_s12 = smov %s2377_s13  ;;  %s2926_s16 = smov %s2397_s18 }
 0x467   : > { %s2923_s10 = smov %s2915_s23  ;;  %32 = sbr.rel (!%p30_p11) target bundleno = 34 (0x22), region = 101 }
 0x469   : > { %s2925_s13 = smov %s2917_s8 }
 0x46b   : > { %s2927_s18 = smov %s2921_s22 }
 0x46e   :  { %1659 = vsyncpa [#allocation7], 1 }
 0x46f   :  { %1661 = vsyncpa [#allocation7 + $0x1], 1 }
 0x470   :  { %1662 = vsyncpa [#allocation8], 1 }
 0x471   :  { %1664 = vsyncpa [#allocation8 + $0x1], 1 }

</bundles_post_ra>
